<compile_context>
chip_gen: v7x
topology: tpu7x:2x2x1
jax: 0.10.0
libtpu: 0.0.40
codegen_flags: <defaults>
</compile_context>

<pallas_src>
import jax
import jax.numpy as jnp
import numpy as np
from jax.experimental import pallas as pl
from jax.experimental.pallas import tpu as pltpu

EPS = 1e-5


# ---------------------------------------------------------------------------
# Kernel A: conv1/2/3 (BN scale folded into weights) + shift + ReLU
#           + global max-pool over points.
# ---------------------------------------------------------------------------
def _conv_pool_kernel(x_ref, w1_ref, t1_ref, w2_ref, t2_ref,
                      w3_ref, t3_ref, o_ref):
    n = pl.program_id(1)

    @pl.when(n == 0)
    def _init():
        # ReLU output is >= 0, so zero is a safe identity for the running max.
        o_ref[...] = jnp.zeros_like(o_ref)

    # Input tile stays channels-first (3, TN) so the HBM->VMEM DMA is
    # lane-dense; flip only the tiny 3-row tile (3*TN elements through the
    # XLU instead of 64*TN for the conv1 output).
    x_t = x_ref[0].T                                 # (TN, 3) f32

    # conv1 (K=3, scale-folded): three broadcast FMAs on the VPU directly in
    # (TN, 64) orientation -- a K=3 matmul would use only 3 MXU rows.
    w1 = w1_ref[...]                                 # (3, 64) f32
    h = (x_t[:, 0:1] * w1[0:1, :]
         + x_t[:, 1:2] * w1[1:2, :]
         + x_t[:, 2:3] * w1[2:3, :])                 # (TN, 64)
    h = jnp.maximum(h + t1_ref[...], 0.0)            # bn1 shift + relu

    # conv2 + bn2-shift + relu (MXU, f32 accumulation; scale in weights).
    h = jnp.dot(h.astype(w2_ref.dtype), w2_ref[...],
                preferred_element_type=jnp.float32)   # (TN, 128)
    h = jnp.maximum(h + t2_ref[...], 0.0)

    # conv3 + bn3-shift + relu.
    h = jnp.dot(h.astype(w3_ref.dtype), w3_ref[...],
                preferred_element_type=jnp.float32)   # (TN, 1024)
    h = jnp.maximum(h + t3_ref[...], 0.0)

    # Padded points are edge-replicated copies of a real point (wrapper-side
    # jnp.pad mode='edge'), so no mask is needed: they cannot change the max.
    # Running max over point tiles, accumulated in the resident output block.
    o_ref[0] = jnp.maximum(o_ref[0], jnp.max(h, axis=0, keepdims=True))


# ---------------------------------------------------------------------------
# Kernel B: fc1/fc2/fc3 (+ bn4/bn5 shifts, scales folded) + identity,
#           batched over all B rows.
# ---------------------------------------------------------------------------
def _fc_kernel(g_ref, wf1_ref, t4_ref, wf2_ref, t5_ref, wf3_ref, b3_ref,
               o_ref):
    g = g_ref[...]                                                # (B, 1024)
    f = jnp.dot(g.astype(wf1_ref.dtype), wf1_ref[...],
                preferred_element_type=jnp.float32)               # (B, 512)
    f = jnp.maximum(f + t4_ref[...], 0.0)
    f = jnp.dot(f.astype(wf2_ref.dtype), wf2_ref[...],
                preferred_element_type=jnp.float32)               # (B, 256)
    f = jnp.maximum(f + t5_ref[...], 0.0)
    out = jnp.dot(f.astype(wf3_ref.dtype), wf3_ref[...],
                  preferred_element_type=jnp.float32)             # (B, 9)
    o_ref[...] = out + b3_ref[...]                 # fc3 bias + flattened identity


# ---------------------------------------------------------------------------
# Wrapper
# ---------------------------------------------------------------------------
def _bn_scale_shift(bias, gamma, beta, mean, var):
    """Eval-mode BN + preceding bias -> per-channel (scale, shift)."""
    scale = gamma / jnp.sqrt(var + EPS)
    shift = beta - mean * scale + bias * scale
    return scale.astype(jnp.float32), shift.reshape(1, -1).astype(jnp.float32)


def stn3d_forward(x, p, *, point_tile=1024, compute_dtype=jnp.bfloat16):
    """x: (B, 3, N) float32 (PyTorch NCW layout).  Returns (B, 3, 3)."""
    B, C, N = x.shape
    assert C == 3
    x = x.astype(jnp.float32)

    # Point-dimension tiling (lane-aligned).  Pad with edge replication so
    # padded points duplicate a real point and can never win the max
    # (removes the need for an in-kernel mask).
    TN = min(point_tile, pl.cdiv(N, 128) * 128)
    n_tiles = pl.cdiv(N, TN)
    n_pad = n_tiles * TN
    if n_pad != N:
        x = jnp.pad(x, ((0, 0), (0, 0), (0, n_pad - N)), mode="edge")

    # Fold eval-mode BN + biases into per-channel scale/shift; fold the
    # scales into the f32 master weight columns BEFORE any bf16 cast so only
    # additive shifts remain in-kernel.
    s1, t1 = _bn_scale_shift(p["b1"], p["g1"], p["be1"], p["m1"], p["v1"])
    s2, t2 = _bn_scale_shift(p["b2"], p["g2"], p["be2"], p["m2"], p["v2"])
    s3, t3 = _bn_scale_shift(p["b3"], p["g3"], p["be3"], p["m3"], p["v3"])
    s4, t4 = _bn_scale_shift(p["bf1"], p["g4"], p["be4"], p["m4"], p["v4"])
    s5, t5 = _bn_scale_shift(p["bf2"], p["g5"], p["be5"], p["m5"], p["v5"])

    w1s = (p["w1"].astype(jnp.float32) * s1).astype(jnp.float32)   # (3, 64)
    w2s = (p["w2"].astype(jnp.float32) * s2).astype(compute_dtype)  # (64, 128)
    w3s = (p["w3"].astype(jnp.float32) * s3).astype(compute_dtype)  # (128, 1024)
    wf1s = (p["wf1"].astype(jnp.float32) * s4).astype(compute_dtype)  # (1024, 512)
    wf2s = (p["wf2"].astype(jnp.float32) * s5).astype(compute_dtype)  # (512, 256)
    wf3 = p["wf3"].astype(jnp.float32)                               # (256, 9)
    eye = jnp.array([1, 0, 0, 0, 1, 0, 0, 0, 1], dtype=jnp.float32)
    b3 = (p["bf3"] + eye).reshape(1, 9).astype(jnp.float32)

    conv_params = [w1s, t1, w2s, t2, w3s, t3]

    def invariant(a):
        # Constant block index for every grid step -> fetched once, no re-DMA.
        return pl.BlockSpec(a.shape, lambda b, n, _z=(0,) * a.ndim: _z)

    conv_flops = 2 * B * n_pad * (3 * 64 + 64 * 128 + 128 * 1024)
    conv_bytes = int(x.size * 4
                     + sum(int(np.prod(a.shape)) * a.dtype.itemsize
                           for a in conv_params)
                     + B * 1024 * 4)

    pooled = pl.pallas_call(
        _conv_pool_kernel,
        out_shape=jax.ShapeDtypeStruct((B, 1, 1024), jnp.float32),
        grid_spec=pltpu.PrefetchScalarGridSpec(
            num_scalar_prefetch=0,
            grid=(B, n_tiles),
            in_specs=[pl.BlockSpec((1, 3, TN), lambda b, n: (b, 0, n))]
                     + [invariant(a) for a in conv_params],
            out_specs=pl.BlockSpec((1, 1, 1024), lambda b, n: (b, 0, 0)),
        ),
        compiler_params=pltpu.CompilerParams(
            dimension_semantics=("parallel", "arbitrary"),
            # Explicit limit: overrides v5e's 16 MiB scoped default at large
            # TN; ~4-8 MiB live at TN=1024-2048 also fits v7x's 64 MiB VMEM.
            vmem_limit_bytes=32 * 1024 * 1024),
        cost_estimate=pl.CostEstimate(flops=conv_flops, transcendentals=0,
                                      bytes_accessed=conv_bytes),
    )(x, *conv_params)

    g = pooled.reshape(B, 1024)                     # free reshape (drop axis 1)

    fc_params = [wf1s, t4, wf2s, t5, wf3, b3]

    def full(a):
        return pl.BlockSpec(a.shape, lambda i, _z=(0,) * a.ndim: _z)

    fc_flops = 2 * B * (1024 * 512 + 512 * 256 + 256 * 9)
    fc_bytes = int(B * 1024 * 4
                   + sum(int(np.prod(a.shape)) * a.dtype.itemsize
                         for a in fc_params)
                   + B * 9 * 4)

    out = pl.pallas_call(
        _fc_kernel,
        out_shape=jax.ShapeDtypeStruct((B, 9), jnp.float32),
        grid_spec=pltpu.PrefetchScalarGridSpec(
            num_scalar_prefetch=0,
            grid=(1,),
            in_specs=[full(g)] + [full(a) for a in fc_params],
            out_specs=pl.BlockSpec((B, 9), lambda i: (0, 0)),
        ),
        compiler_params=pltpu.CompilerParams(
            dimension_semantics=("arbitrary",)),
        cost_estimate=pl.CostEstimate(flops=fc_flops, transcendentals=0,
                                      bytes_accessed=fc_bytes),
    )(g, *fc_params)

    return out.reshape(B, 3, 3)


# ---------------------------------------------------------------------------
# Plain-JAX reference (eval-mode BN), mirroring the PyTorch forward.
# ---------------------------------------------------------------------------
def _reference(x, p):
    h = jnp.transpose(x, (0, 2, 1)).astype(jnp.float32)

    def bn(y, g, be, m, v):
        return (y - m) / jnp.sqrt(v + EPS) * g + be

    h = jax.nn.relu(bn(h @ p["w1"] + p["b1"], p["g1"], p["be1"], p["m1"], p["v1"]))
    h = jax.nn.relu(bn(h @ p["w2"] + p["b2"], p["g2"], p["be2"], p["m2"], p["v2"]))
    h = jax.nn.relu(bn(h @ p["w3"] + p["b3"], p["g3"], p["be3"], p["m3"], p["v3"]))
    g = jnp.max(h, axis=1)                                        # (B, 1024)
    f = jax.nn.relu(bn(g @ p["wf1"] + p["bf1"], p["g4"], p["be4"], p["m4"], p["v4"]))
    f = jax.nn.relu(bn(f @ p["wf2"] + p["bf2"], p["g5"], p["be5"], p["m5"], p["v5"]))
    eye = jnp.array([1, 0, 0, 0, 1, 0, 0, 0, 1], dtype=jnp.float32)
    out = f @ p["wf3"] + p["bf3"] + eye
    return out.reshape(-1, 3, 3)


def _init_params(key):
    dims = dict(w1=(3, 64), w2=(64, 128), w3=(128, 1024),
                wf1=(1024, 512), wf2=(512, 256), wf3=(256, 9))
    bn_dims = {f"{i}": d for i, d in zip(range(1, 6),
                                         (64, 128, 1024, 512, 256))}
    p = {}
    keys = jax.random.split(key, 32)
    ki = iter(keys)
    for name, (fan_in, fan_out) in dims.items():
        p[name] = (jax.random.normal(next(ki), (fan_in, fan_out), jnp.float32)
                   / jnp.sqrt(jnp.float32(fan_in)))
    for bname, w in (("b1", 64), ("b2", 128), ("b3", 1024),
                     ("bf1", 512), ("bf2", 256), ("bf3", 9)):
        p[bname] = 0.01 * jax.random.normal(next(ki), (w,), jnp.float32)
    for i, w in bn_dims.items():
        p[f"g{i}"] = 1.0 + 0.1 * jax.random.normal(next(ki), (w,), jnp.float32)
        p[f"be{i}"] = 0.1 * jax.random.normal(next(ki), (w,), jnp.float32)
        p[f"m{i}"] = 0.05 * jax.random.normal(next(ki), (w,), jnp.float32)
        p[f"v{i}"] = 1.0 + 0.1 * jnp.abs(jax.random.normal(next(ki), (w,), jnp.float32))
    return p


if __name__ == "__main__":
    key = jax.random.PRNGKey(0)
    kx, kp = jax.random.split(key)
    B, N = 4, 200      # N not a multiple of the 128-point tile -> exercises edge padding
    x = jax.random.normal(kx, (B, 3, N), jnp.float32)
    params = _init_params(kp)

    ref = _reference(x, params)

    # f32 compute path, small tile -> multiple point tiles + padded last tile:
    # tight check against the plain-JAX reference.
    out_f32 = jax.block_until_ready(
        stn3d_forward(x, params, point_tile=128, compute_dtype=jnp.float32))
    np.testing.assert_allclose(np.asarray(out_f32), np.asarray(ref),
                               rtol=2e-3, atol=2e-3)

    # bf16 MXU path (production default tile): loose numerical sanity check.
    out_bf16 = jax.block_until_ready(
        stn3d_forward(x, params, compute_dtype=jnp.bfloat16))
    np.testing.assert_allclose(np.asarray(out_bf16), np.asarray(ref),
                               rtol=5e-2, atol=2e-1)

    assert out_f32.shape == (B, 3, 3)
    print("KERNEL_OK")
</pallas_src>

<mosaic_0001>
module attributes {stable_mosaic.version = 11 : i64} {
  func.func @_conv_pool_kernel(%arg0: i32, %arg1: i32, %arg2: memref<1x3x128xf32, #tpu.memory_space<vmem>>, %arg3: memref<3x64xf32, #tpu.memory_space<vmem>>, %arg4: memref<1x64xf32, #tpu.memory_space<vmem>>, %arg5: memref<64x128xf32, #tpu.memory_space<vmem>>, %arg6: memref<1x128xf32, #tpu.memory_space<vmem>>, %arg7: memref<128x1024xf32, #tpu.memory_space<vmem>>, %arg8: memref<1x1024xf32, #tpu.memory_space<vmem>>, %arg9: memref<1x1x1024xf32, #tpu.memory_space<vmem>>) attributes {dimension_semantics = [#tpu.dimension_semantics<parallel>, #tpu.dimension_semantics<arbitrary>], iteration_bounds = array<i64: 4, 2>, scalar_prefetch = 0 : i64, scratch_operands = 0 : i64, tpu.core_type = #tpu.core_type<tc>, window_params = [{transform_indices = @transform_0, window_bounds = array<i64: 1, 3, 128>}, {pipeline_mode = #tpu.pipeline_mode<synchronous>, transform_indices = @transform_1, window_bounds = array<i64: 3, 64>}, {pipeline_mode = #tpu.pipeline_mode<synchronous>, transform_indices = @transform_2, window_bounds = array<i64: 1, 64>}, {pipeline_mode = #tpu.pipeline_mode<synchronous>, transform_indices = @transform_3, window_bounds = array<i64: 64, 128>}, {pipeline_mode = #tpu.pipeline_mode<synchronous>, transform_indices = @transform_4, window_bounds = array<i64: 1, 128>}, {pipeline_mode = #tpu.pipeline_mode<synchronous>, transform_indices = @transform_5, window_bounds = array<i64: 128, 1024>}, {pipeline_mode = #tpu.pipeline_mode<synchronous>, transform_indices = @transform_6, window_bounds = array<i64: 1, 1024>}, {transform_indices = @transform_7, window_bounds = array<i64: 1, 1, 1024>}]} {
    %c0_i32 = arith.constant 0 : i32
    %0 = arith.cmpi eq, %arg1, %c0_i32 : i32
    %1 = arith.extui %0 : i1 to i32
    %c0_i32_0 = arith.constant 0 : i32
    %2 = arith.cmpi ne, %1, %c0_i32_0 : i32
    scf.if %2 {
      %cst_26 = arith.constant 0.000000e+00 : f32
      %51 = vector.broadcast %cst_26 : f32 to vector<1x1x1024xf32>
      %c0_27 = arith.constant 0 : index
      %c0_28 = arith.constant 0 : index
      %c0_29 = arith.constant 0 : index
      %52 = vector.load %arg9[%c0_27, %c0_28, %c0_29] : memref<1x1x1024xf32, #tpu.memory_space<vmem>>, vector<1x1x1024xf32>
      tpu.vector_store %arg9[%c0_27, %c0_28, %c0_29], %51 {strides = array<i32>} : memref<1x1x1024xf32, #tpu.memory_space<vmem>>, vector<1x1x1024xf32>,
    } else {
    }
    %c0 = arith.constant 0 : index
    %c0_1 = arith.constant 0 : index
    %c0_2 = arith.constant 0 : index
    %3 = vector.load %arg2[%c0, %c0_1, %c0_2] : memref<1x3x128xf32, #tpu.memory_space<vmem>>, vector<1x3x128xf32>
    %4 = vector.shape_cast %3 : vector<1x3x128xf32> to vector<3x128xf32>
    %5 = tpu.transpose %4, [1, 0] : vector<3x128xf32> -> vector<128x3xf32>
    %c0_3 = arith.constant 0 : index
    %c0_4 = arith.constant 0 : index
    %6 = vector.load %arg3[%c0_3, %c0_4] : memref<3x64xf32, #tpu.memory_space<vmem>>, vector<3x64xf32>
    %7 = vector.extract_strided_slice %5 {offsets = [0, 0], sizes = [128, 1], strides = [1, 1]} : vector<128x3xf32> to vector<128x1xf32>
    %8 = vector.extract_strided_slice %6 {offsets = [0, 0], sizes = [1, 64], strides = [1, 1]} : vector<3x64xf32> to vector<1x64xf32>
    %9 = vector.broadcast %7 : vector<128x1xf32> to vector<128x64xf32>
    %10 = vector.broadcast %8 : vector<1x64xf32> to vector<128x64xf32>
    %11 = arith.mulf %9, %10 : vector<128x64xf32>
    %12 = vector.extract_strided_slice %5 {offsets = [0, 1], sizes = [128, 1], strides = [1, 1]} : vector<128x3xf32> to vector<128x1xf32>
    %13 = vector.extract_strided_slice %6 {offsets = [1, 0], sizes = [1, 64], strides = [1, 1]} : vector<3x64xf32> to vector<1x64xf32>
    %14 = vector.broadcast %12 : vector<128x1xf32> to vector<128x64xf32>
    %15 = vector.broadcast %13 : vector<1x64xf32> to vector<128x64xf32>
    %16 = arith.mulf %14, %15 : vector<128x64xf32>
    %17 = arith.addf %11, %16 : vector<128x64xf32>
    %18 = vector.extract_strided_slice %5 {offsets = [0, 2], sizes = [128, 1], strides = [1, 1]} : vector<128x3xf32> to vector<128x1xf32>
    %19 = vector.extract_strided_slice %6 {offsets = [2, 0], sizes = [1, 64], strides = [1, 1]} : vector<3x64xf32> to vector<1x64xf32>
    %20 = vector.broadcast %18 : vector<128x1xf32> to vector<128x64xf32>
    %21 = vector.broadcast %19 : vector<1x64xf32> to vector<128x64xf32>
    %22 = arith.mulf %20, %21 : vector<128x64xf32>
    %23 = arith.addf %17, %22 : vector<128x64xf32>
    %c0_5 = arith.constant 0 : index
    %c0_6 = arith.constant 0 : index
    %24 = vector.load %arg4[%c0_5, %c0_6] : memref<1x64xf32, #tpu.memory_space<vmem>>, vector<1x64xf32>
    %25 = vector.broadcast %24 : vector<1x64xf32> to vector<128x64xf32>
    %26 = arith.addf %23, %25 : vector<128x64xf32>
    %cst = arith.constant 0.000000e+00 : f32
    %27 = vector.broadcast %cst : f32 to vector<128x64xf32>
    %28 = arith.maximumf %26, %27 : vector<128x64xf32>
    %c0_7 = arith.constant 0 : index
    %c0_8 = arith.constant 0 : index
    %29 = vector.load %arg5[%c0_7, %c0_8] : memref<64x128xf32, #tpu.memory_space<vmem>>, vector<64x128xf32>
    %cst_9 = arith.constant dense<0.000000e+00> : vector<128x128xf32>
    %30 = tpu.matmul %28, %29, %cst_9 {dimension_numbers = #tpu.dot_dimension_numbers<[1], [0], [0], [1], [0, 0, 1, 1], [], []>} : vector<128x64xf32>, vector<64x128xf32>, vector<128x128xf32> -> vector<128x128xf32>
    %c0_10 = arith.constant 0 : index
    %c0_11 = arith.constant 0 : index
    %31 = vector.load %arg6[%c0_10, %c0_11] : memref<1x128xf32, #tpu.memory_space<vmem>>, vector<1x128xf32>
    %32 = vector.broadcast %31 : vector<1x128xf32> to vector<128x128xf32>
    %33 = arith.addf %30, %32 : vector<128x128xf32>
    %cst_12 = arith.constant 0.000000e+00 : f32
    %34 = vector.broadcast %cst_12 : f32 to vector<128x128xf32>
    %35 = arith.maximumf %33, %34 : vector<128x128xf32>
    %c0_13 = arith.constant 0 : index
    %c0_14 = arith.constant 0 : index
    %36 = vector.load %arg7[%c0_13, %c0_14] : memref<128x1024xf32, #tpu.memory_space<vmem>>, vector<128x1024xf32>
    %cst_15 = arith.constant dense<0.000000e+00> : vector<128x1024xf32>
    %37 = tpu.matmul %35, %36, %cst_15 {dimension_numbers = #tpu.dot_dimension_numbers<[1], [0], [0], [1], [0, 0, 1, 1], [], []>} : vector<128x128xf32>, vector<128x1024xf32>, vector<128x1024xf32> -> vector<128x1024xf32>
    %c0_16 = arith.constant 0 : index
    %c0_17 = arith.constant 0 : index
    %38 = vector.load %arg8[%c0_16, %c0_17] : memref<1x1024xf32, #tpu.memory_space<vmem>>, vector<1x1024xf32>
    %39 = vector.broadcast %38 : vector<1x1024xf32> to vector<128x1024xf32>
    %40 = arith.addf %37, %39 : vector<128x1024xf32>
    %cst_18 = arith.constant 0.000000e+00 : f32
    %41 = vector.broadcast %cst_18 : f32 to vector<128x1024xf32>
    %42 = arith.maximumf %40, %41 : vector<128x1024xf32>
    %c0_19 = arith.constant 0 : index
    %c0_20 = arith.constant 0 : index
    %c0_21 = arith.constant 0 : index
    %43 = vector.load %arg9[%c0_19, %c0_20, %c0_21] : memref<1x1x1024xf32, #tpu.memory_space<vmem>>, vector<1x1x1024xf32>
    %44 = vector.shape_cast %43 : vector<1x1x1024xf32> to vector<1x1024xf32>
    %cst_22 = arith.constant dense<0xFF800000> : vector<1024xf32>
    %45 = vector.multi_reduction <maximumf>, %42, %cst_22 [0] : vector<128x1024xf32> to vector<1024xf32>
    %46 = vector.shape_cast %45 : vector<1024xf32> to vector<1x1024xf32>
    %47 = arith.maximumf %44, %46 : vector<1x1024xf32>
    %c0_23 = arith.constant 0 : index
    %c0_24 = arith.constant 0 : index
    %c0_25 = arith.constant 0 : index
    %48 = vector.load %arg9[%c0_23, %c0_24, %c0_25] : memref<1x1x1024xf32, #tpu.memory_space<vmem>>, vector<1x1x1024xf32>
    %49 = vector.shape_cast %48 : vector<1x1x1024xf32> to vector<1x1024xf32>
    %50 = vector.shape_cast %47 : vector<1x1024xf32> to vector<1x1x1024xf32>
    tpu.vector_store %arg9[%c0_23, %c0_24, %c0_25], %50 {strides = array<i32>} : memref<1x1x1024xf32, #tpu.memory_space<vmem>>, vector<1x1x1024xf32>,
    return
  }
  func.func @transform_0(%arg0: i32, %arg1: i32) -> (i32, i32, i32) {
    %c0_i32 = arith.constant 0 : i32
    %c0_i32_0 = arith.constant 0 : i32
    return %arg0, %c0_i32, %arg1 : i32, i32, i32
  }
  func.func @transform_1(%arg0: i32, %arg1: i32) -> (i32, i32) {
    %c0_i32 = arith.constant 0 : i32
    %c0_i32_0 = arith.constant 0 : i32
    %c0_i32_1 = arith.constant 0 : i32
    return %c0_i32, %c0_i32_0 : i32, i32
  }
  func.func @transform_2(%arg0: i32, %arg1: i32) -> (i32, i32) {
    %c0_i32 = arith.constant 0 : i32
    %c0_i32_0 = arith.constant 0 : i32
    %c0_i32_1 = arith.constant 0 : i32
    return %c0_i32, %c0_i32_0 : i32, i32
  }
  func.func @transform_3(%arg0: i32, %arg1: i32) -> (i32, i32) {
    %c0_i32 = arith.constant 0 : i32
    %c0_i32_0 = arith.constant 0 : i32
    %c0_i32_1 = arith.constant 0 : i32
    return %c0_i32, %c0_i32_0 : i32, i32
  }
  func.func @transform_4(%arg0: i32, %arg1: i32) -> (i32, i32) {
    %c0_i32 = arith.constant 0 : i32
    %c0_i32_0 = arith.constant 0 : i32
    %c0_i32_1 = arith.constant 0 : i32
    return %c0_i32, %c0_i32_0 : i32, i32
  }
  func.func @transform_5(%arg0: i32, %arg1: i32) -> (i32, i32) {
    %c0_i32 = arith.constant 0 : i32
    %c0_i32_0 = arith.constant 0 : i32
    %c0_i32_1 = arith.constant 0 : i32
    return %c0_i32, %c0_i32_0 : i32, i32
  }
  func.func @transform_6(%arg0: i32, %arg1: i32) -> (i32, i32) {
    %c0_i32 = arith.constant 0 : i32
    %c0_i32_0 = arith.constant 0 : i32
    %c0_i32_1 = arith.constant 0 : i32
    return %c0_i32, %c0_i32_0 : i32, i32
  }
  func.func @transform_7(%arg0: i32, %arg1: i32) -> (i32, i32, i32) {
    %c0_i32 = arith.constant 0 : i32
    %c0_i32_0 = arith.constant 0 : i32
    %c0_i32_1 = arith.constant 0 : i32
    return %arg0, %c0_i32, %c0_i32_0 : i32, i32, i32
  }
}

</mosaic_0001>

<bundles_post_ra>
// kernel: tpu_custom_call.1
= control target key start
LH: loop header
LB: loop body
LE: loop exit
PB: predicated region body
PF: predicated region fallthrough
CT: control target
= control target key end

     0   :  { %12 = vsyncpa [#allocation3], 0  ;;  %s3676_s0 = inlined_call_operand.vmem [shape: f32[4,3,256], index: 0, kind: input, shape index: {}]   ;;  %s3677_s1 = inlined_call_operand.hbm [shape: f32[3,64], index: 1, kind: input, shape index: {}]   ;;  %s3678_s2 = inlined_call_operand.vmem [shape: f32[1,64], index: 2, kind: input, shape index: {}]   ;;  %s3679_s3 = inlined_call_operand.vmem [shape: f32[64,128], index: 3, kind: input, shape index: {}]   ;;  %s3680_s4 = inlined_call_operand.vmem [shape: f32[1,128], index: 4, kind: input, shape index: {}]   ;;  %s3681_s5 = inlined_call_operand.hbm [shape: f32[128,1024], index: 5, kind: input, shape index: {}]   ;;  %s3682_s6 = inlined_call_operand.vmem [shape: f32[1,1024], index: 6, kind: input, shape index: {}]   ;;  %s3683_s7 = inlined_call_operand.hbm [shape: f32[4,1,1024], index: 7, kind: output, shape index: {}]  }
   0x1   :  { %13 = vsyncpa [#allocation6], 0 }
   0x2   :  { %14 = vsyncpa [#allocation4], 0 }
   0x3   :  { %16 = vsyncpa [#allocation4 + $0x1], 0  ;;  %s2829_s24 = smov 0   ;;  %s2831_s25 = smov 0  }
   0x4   :  { %s2833_s26 = smov 0   ;;  %s2835_s27 = smov 0  }
   0x5   :  { %s2837_s28 = smov 0   ;;  %s2839_s29 = smov 0  }
   0x6   :  { %s2841_s30 = smov 0   ;;  %s2843_s8 = smov 0  }
   0x7 LB: > { %3691 = sst [smem:[#allocation11_spill]] %s2768_s29  ;;  %s2215_s9 = sadd.s32 4294967295, %s2776_s8   ;;  %s2776_s8 = sphi %s2843_s8, %s22_s8   ;;  %s2772_s30 = sphi %s2841_s30, %s3707_s30   ;;  %s2768_s29 = sphi %s2839_s29, %s3706_s29   ;;  %s2764_s28 = sphi %s2837_s28, %s3705_s28   ;;  %s2760_s27 = sphi %s2835_s27, %s3704_s27   ;;  %s2756_s26 = sphi %s2833_s26, %s3710_s26   ;;  %s2752_s25 = sphi %s2831_s25, %s3709_s25   ;;  %s2748_s24 = sphi %s2829_s24, %s3708_s24  }
   0x8   : > { %3692 = sst [smem:[#allocation12_spill]] %s2772_s30  ;;  %s2216_s10 = sadd.s32 4294967294, %s2776_s8  }
   0x9   : > { %s31_s11 = sadd.s32 1, %s2768_s29  ;;  %s34_s12 = sadd.s32 1, %s2772_s30 }
   0xa   : > { %p32_p0 = scmp.ge.s32.totalorder %s31_s11, 2  ;;  %s195_s13 = sadd.s32 1, %s2756_s26 }
   0xb   : > { %p205_p1 = scmp.ne.s32.totalorder %s2756_s26, %s2752_s25  ;;  %p206_p2 = scmp.eq.s32.totalorder %s2215_s9, 7 }
   0xc   : > { %s3712_s11 = smov (%p32_p0, %s31_s11), 0  ;;  %s3714_s12 = smov (!%p32_p0, %s34_s12), %s2772_s30 }
   0xd   : > { %3693 = sst [smem:[#allocation13_spill]] %s3712_s11  ;;  %p2879_p3 = por %p206_p2, %p205_p1 }
   0xe   : > { %p211_p4 = scmp.ne.s32.totalorder %s2752_s25, %s2748_s24  ;;  %p36_p5 = scmp.ge.s32.totalorder %s3714_s12, 4 }
   0xf   : > { %s3694_s14 = scalar_select %p2879_p3, 1, 0 }
  0x10   : > { %p212_p6 = scmp.eq.s32.totalorder %s2216_s10, 7  ;;  %p2217_p7 = scmp.ge.s32.totalorder %s2776_s8, 1 }
  0x11   : > { %p219_p8 = scmp.lt.s32.totalorder %s2776_s8, 9  ;;  %s3716_s12 = smov (%p36_p5, %s3714_s12), 0 }
  0x12   : > { %3695 = sst [smem:[#allocation14_spill]] %s3716_s12  ;;  %p2889_p9 = por %p212_p6, %p211_p4 }
  0x13   : > { %p2893_p10 = pnand %p2217_p7, %p219_p8  ;;  %s192_s17 = ssub.s32 %s2772_s30, %s3716_s12 }
  0x14   : > { %s3696_s15 = scalar_select %p2889_p9, 1, 0 }
  0x15   : > { %s3697_s16 = scalar_select %p2893_p10, 1, 0 }
  0x16   : > { %p193_p11 = scmp.eq.s32.totalorder %s192_s17, 0  ;;  %p2486_p12 = pneg %p2893_p10 }
  0x17   : > { %p2901_p13 = scmp.eq.s32.totalorder %s2215_s9, 0  ;;  %s2778_s20 = smov [#allocation2]  }
  0x18   : > { %s2906_s19 = scalar_select %p193_p11, %s2756_s26, %s195_s13  }
  0x19   : > { %s3698_s18 = scalar_select %p2901_p13, 1, 0 }
  0x1a   : > { %s232_s21 = sshll.u32 %s2778_s20, 4  ;;  %p2910_p0 = pnand %p2901_p13, %p2486_p12  ;;  %s233_s21 = int_to_ptr.vmem [resolvable:$true] %s232_s21 }
  0x1b   : > { %s2779_s23 = smov [#allocation5]   ;;  %s2618_s12 = scalar_lea.hbm %s3677_s1, 64 }
  0x1c   : > { %s251_s10 = sshll.u32 %s2779_s23, 4  ;;  %p2619_p1 = scmp.ne.s32.totalorder %s3677_s1, %s2618_s12  ;;  %s252_s10 = int_to_ptr.vmem [resolvable:$true] %s251_s10 }
  0x1d   : > { %p2620_p2 = pneg %p2910_p0  ;;  %p2625_p6 = scmp.lt.u32.totalorder %s2618_s12, %s3677_s1 }
  0x1f   : > { %p2621_p4 = pnand %p2620_p2, %p2619_p1 }
  0x21   : > { %p2622_p5 = pneg %p2621_p4 }
  0x23   : > { %p2627_p7 = pnand %p2625_p6, %p2622_p5 }
  0x25   : > { %2630 = shalt.err (!%p2627_p7)
}
  0x26   : > { %s2631_s23 = scalar_lea.vmem %s233_s21, 64  ;;  %p2639_p9 = scmp.lt.s32.totalorder %s233_s21, %s233_s21 }
  0x27   : > { %p2632_p8 = scmp.ne.s32.totalorder %s233_s21, %s2631_s23  ;;  %p2640_p3 = scmp.lt.s32.totalorder %s2631_s23, %s2631_s23 }
  0x29   : > { %p2634_p11 = pnand %p2632_p8, %p2620_p2  ;;  %p2641_p13 = por %p2640_p3, %p2639_p9 }
  0x2b   : > { %p2635_p12 = pneg %p2634_p11 }
  0x2d   : > { %p2642_p10 = pnand %p2641_p13, %p2635_p12 }
  0x2f   : > { %2645 = shalt.err (!%p2642_p10)
}
  0x30   : > { %2489 = dma.hbm_to_vmem [thread:$0]  (!%p2910_p0), %s3677_s1, 64, %s233_s21, [#allocation3]  }
  0x31   : > { %s2646_s9 = scalar_lea.hbm %s3681_s5, 16384 }
  0x32   : > { %p2647_p1 = scmp.ne.s32.totalorder %s3681_s5, %s2646_s9  ;;  %p2653_p10 = scmp.lt.u32.totalorder %s2646_s9, %s3681_s5 }
  0x34   : > { %p2649_p3 = pnand %p2647_p1, %p2620_p2 }
  0x36   : > { %p2650_p9 = pneg %p2649_p3 }
  0x38   : > { %p2655_p13 = pnand %p2653_p10, %p2650_p9 }
  0x3a   : > { %2658 = shalt.err (!%p2655_p13)
}
  0x3b   : > { %s2659_s21 = scalar_lea.vmem %s252_s10, 16384  ;;  %p2667_p7 = scmp.lt.s32.totalorder %s252_s10, %s252_s10 }
  0x3c   : > { %p2660_p4 = scmp.ne.s32.totalorder %s252_s10, %s2659_s21  ;;  %p2668_p8 = scmp.lt.s32.totalorder %s2659_s21, %s2659_s21 }
  0x3e   : > { %p2662_p5 = pnand %p2660_p4, %p2620_p2  ;;  %p2669_p11 = por %p2668_p8, %p2667_p7 }
  0x40   : > { %p2663_p6 = pneg %p2662_p5 }
  0x42   : > { %p2670_p12 = pnand %p2669_p11, %p2663_p6 }
  0x44   : > { %2673 = shalt.err (!%p2670_p12)
}
  0x45   : > { %s2780_s30 = smov 1024   ;;  %s2781_s11 = smov 64  }
  0x46   : > { %2492 = dma.hbm_to_vmem [thread:$0]  (!%p2910_p0), %s3681_s5, 16384, %s252_s10, [#allocation6], %s2780_s30, %s2780_s30, %s2781_s11  }
  0x47   : > { %p3700_p1 = scmp.ne.s32.totalorder %s3697_s16, 0 }
  0x48   : > { %p3701_p3 = scmp.ne.s32.totalorder (!%p3700_p1), %s3698_s18, 0 }
  0x49   : > { %281 = sbr.rel (%p3700_p1) target bundleno = 1105 (0x451), region = 48 }
  0x50   : > { %2735 = dma.done.wait (%p3701_p3), [#allocation3], 64  }
  0x51   : > { %2737 = vsyncadd (%p3701_p3), [#allocation3], 4294967232 }
  0x52   : > { %2739 = dma.done.wait (%p3701_p3), [#allocation6], 16384  }
  0x53   : > { %2741 = vsyncadd (%p3701_p3), [#allocation6], 4294950912  ;;  %s317_s16 = sand.u32 1, %s2752_s25   ;;  %p320_p0 = scmp.lt.s32.totalorder %s2764_s28, 3 }
  0x54   : > { %s2224_s22 = sshll.u32 %s317_s16, 3  ;;  %p322_p2 = scmp.lt.s32.totalorder %s2760_s27, 1 }
  0x55   : > { %s321_s10 = scalar_select %p320_p0, %s2764_s28, 3 }
  0x56   : > { %s323_s17 = scalar_select %p322_p2, %s2760_s27, 1 }
  0x57   : > { %s2225_s9 = sshll.u32 %s321_s10, 1  ;;  %s2976_s30 = scalar_lea.vmem [#allocation7], %s2224_s22 }
  0x58   : > { %s325_s13 = sadd.s32 %s2225_s9, %s323_s17  ;;  %p2227_p9 = scmp.ne.s32.totalorder %s2760_s27, 0 }
  0x59   : > { %s2226_s20 = sshll.u32 %s325_s13, 2  ;;  %v2782_v0 = vmov (!%p2227_p9), 0.0  }
  0x5a   : > { %s327_s18 = scalar_lea.vmem %s3676_s0, %s2226_s20  ;;  %331 = sbr.rel (%p2227_p9) target bundleno = 97 (0x61), region = 60  ;;  %332 = vst [vmem:[%s2976_s30] sm:$0xff] (!%p2227_p9), %v2782_v0 }
  0x61 PF: > { %v333_v1 = vld [vmem:[%s327_s18] sm:$0x7]  ;;  %v2783_v2 = vmov 1   ;;  %v2784_v3 = vmov 0   ;;  %v2785_v6 = vmov 2   ;;  %v707_v9 = vld [vmem:[%s3679_s3 + $0x8] sm:$0xff]  ;;  %v447_v32 = vlaneseq }
  0x62   : > { %334 = vxpose.xlu0.b32.start.end [1/1] (short) %v333_v1, 128  ;;  %2577 = vset.pattern.permute.xlu1 %v2783_v2  ;;  %v706_v8 = vld [vmem:[%s3679_s3] sm:$0xff]  ;;  %v708_v12 = vld [vmem:[%s3679_s3 + $0x10] sm:$0xff]  ;;  %v709_v13 = vld [vmem:[%s3679_s3 + $0x18] sm:$0xff]  ;;  %vm721_vm0 = vcmask 523264   ;;  %s2251_s20 = sshll.u32 %s2764_s28, 7  ;;  %s2117_s23 = sshll.u32 %s2976_s30, 4  ;;  %s3622_s23 = int_to_ptr.vmem [resolvable:$true] %s2117_s23 }
  0x63   : > { %v2316_v10 = vpack.c.bf16 %v707_v9, %v706_v8  ;;  %v2320_v14 = vpack.c.bf16 %v709_v13, %v708_v12  ;;  %v710_v16 = vld [vmem:[%s3679_s3 + $0x20] sm:$0xff]  ;;  %v711_v17 = vld [vmem:[%s3679_s3 + $0x28] sm:$0xff]  ;;  %v712_v20 = vld [vmem:[%s3679_s3 + $0x30] sm:$0xff]  ;;  %v3051_v33 = vshrl.u32 %v447_v32, 7  ;;  %s3620_s27 = scalar_lea.hbm %s3683_s7, %s2251_s20  ;;  %s2103_s11 = scalar_lea.sflag [#allocation4], %s317_s16 }
  0x64   : > { %v2324_v18 = vpack.c.bf16 %v711_v17, %v710_v16  ;;  %v713_v21 = vld [vmem:[%s3679_s3 + $0x38] sm:$0xff]  ;;  %v366_v37 = vld [vmem:[#allocation2] sm:$0x7]  ;;  %v940_v32 = vld [vmem:[#allocation5 + $0x48] sm:$0xff]  ;;  %s2674_s29 = scalar_lea.vmem %s3622_s23, 128  ;;  %p3702_p13 = scmp.ne.s32.totalorder %s3694_s14, 0 }
  0x65   : > { %2317 = vmatprep.subr.bf16.mxu0 %v2316_v10  ;;  %v2328_v22 = vpack.c.bf16 %v713_v21, %v712_v20  ;;  %v533_v35 = vsub.s32 1, %v3051_v33  ;;  %v449_v36 = vsub.s32 0, %v3051_v33  ;;  %v633_v40 = vsub.s32 2, %v3051_v33  ;;  %v3082_v49 = vld [vmem:[%s3678_s2] ss:$0 sm:$0xff]  ;;  %p2675_p10 = scmp.ne.s32.totalorder %s3622_s23, %s2674_s29  ;;  %s2788_s28 = smov [#allocation7]  }
  0x66   : > { %2319 = vmatpush3.bf16.msra.mxu0 %v2316_v10  ;;  %s2678_s12 = sshll.u32 %s2788_s28, 4  ;;  %s2679_s12 = int_to_ptr.vmem [resolvable:$false] %s2678_s12 }
  0x67   : > { %2321 = vmatprep.subr.bf16.mxu0 %v2320_v14  ;;  %v3062_v38 = vrot.slane %v366_v37, %v533_v35  ;;  %v3066_v39 = vrot.slane %v366_v37, %v449_v36  ;;  %v3074_v45 = vrot.slane %v366_v37, %v633_v40  ;;  %v934_v37 = vld [vmem:[#allocation5 + $0x18] sm:$0xff]  ;;  %p2676_p4 = pnand %p2675_p10, %p3702_p13  ;;  %s2680_s22 = scalar_lea.vmem %s2679_s12, 256 }
  0x68   : > { %p2681_p6 = scmp.lt.s32.totalorder %s3622_s23, %s2679_s12  ;;  %p2682_p7 = scmp.lt.s32.totalorder %s2680_s22, %s2674_s29 }
  0x69   : > { %p2677_p5 = pneg %p2676_p4 }
  0x6a   : > { %2323 = vmatpush3.bf16.msra.mxu0 %v2320_v14  ;;  %p2683_p8 = por %p2682_p7, %p2681_p6 }
  0x6b   : > { %2325 = vmatprep.subr.bf16.mxu0 %v2324_v18 }
  0x6c   : > { %p2684_p11 = pnand %p2683_p8, %p2677_p5 }
  0x6e   : > { %2327 = vmatpush3.bf16.msra.mxu0 %v2324_v18 }
  0x6f   : > { %2329 = vmatprep.subr.bf16.mxu0 %v2328_v22 }
  0x72   : > { %2331 = vmatpush3.bf16.msra.mxu0 %v2328_v22 }
  0x8b   : > { %2576 = vset.pattern.permute.xlu0 %v2784_v3 }
  0xe2   : > { %v350_v4 = vpop.trf.xlu0 }
  0xe3   : > { %468 = vperm.xlu1 %2577, %v350_v4   ;;  %369 = vperm.xlu0 %2576, %v350_v4  }
  0xe6   : > { %v351_v5 = vpop.trf.xlu0 }
  0xe7   : > { %2578 = vset.pattern.permute.xlu1 %v2785_v6  ;;  %2606 = vset.pattern.permute.xlu0 %v2783_v2 }
  0xe8   : > { %568 = vperm.xlu1 %2578, %v350_v4  }
  0xea   : > { %v352_v7 = vpop.trf.xlu0 }
  0xec   : > { %2579 = vset.pattern.permute.xlu1 %v2784_v3 }
  0xed   : > { %374 = vperm.xlu1 %2579, %v351_v5  }
  0xee   : > { %v353_v11 = vpop.trf.xlu0 }
  0xf1   : > { %2580 = vset.pattern.permute.xlu1 %v2783_v2 }
  0xf2   : > { %472 = vperm.xlu1 %2580, %v351_v5   ;;  %v354_v15 = vpop.trf.xlu0 }
  0xf6   : > { %2581 = vset.pattern.permute.xlu1 %v2785_v6  ;;  %v355_v19 = vpop.trf.xlu0 }
  0xf7   : > { %572 = vperm.xlu1 %2581, %v351_v5  }
  0xfa   : > { %v356_v23 = vpop.trf.xlu0 }
  0xfb   : > { %2582 = vset.pattern.permute.xlu1 %v2784_v3 }
  0xfc   : > { %379 = vperm.xlu1 %2582, %v352_v7  }
  0xfe   : > { %v357_v24 = vpop.trf.xlu0 }
 0x100   : > { %2583 = vset.pattern.permute.xlu1 %v2783_v2 }
 0x101   : > { %476 = vperm.xlu1 %2583, %v352_v7  }
 0x102   : > { %v358_v25 = vpop.trf.xlu0 }
 0x105   : > { %2584 = vset.pattern.permute.xlu1 %v2785_v6 }
 0x106   : > { %576 = vperm.xlu1 %2584, %v352_v7   ;;  %v3014_v26 = vpop.trf.xlu0 }
 0x10a   : > { %2585 = vset.pattern.permute.xlu1 %v2784_v3  ;;  %v3017_v27 = vpop.trf.xlu0 }
 0x10b   : > { %384 = vperm.xlu1 %2585, %v353_v11   ;;  %508 = vperm.xlu0 %2606, %v3017_v27  }
 0x10e   : > { %v3020_v28 = vpop.trf.xlu0 }
 0x10f   : > { %2586 = vset.pattern.permute.xlu1 %v2783_v2  ;;  %2607 = vset.pattern.permute.xlu0 %v2785_v6 }
 0x110   : > { %480 = vperm.xlu1 %2586, %v353_v11   ;;  %600 = vperm.xlu0 %2607, %v358_v25  }
 0x112   : > { %v3025_v29 = vpop.trf.xlu0 }
 0x114   : > { %2587 = vset.pattern.permute.xlu1 %v2785_v6  ;;  %608 = vperm.xlu0 %2607, %v3017_v27  }
 0x115   : > { %580 = vperm.xlu1 %2587, %v353_v11  }
 0x116   : > { %v3030_v30 = vpop.trf.xlu0 }
 0x118   : > { %616 = vperm.xlu0 %2607, %v3025_v29  }
 0x119   : > { %2588 = vset.pattern.permute.xlu1 %v2784_v3 }
 0x11a   : > { %389 = vperm.xlu1 %2588, %v354_v15   ;;  %v3035_v31 = vpop.trf.xlu0 }
 0x11c   : > { %2612 = vset.pattern.permute.xlu0 %v2783_v2 }
 0x11d   : > { %516 = vperm.xlu0 %2612, %v3025_v29  }
 0x11e   : > { %2589 = vset.pattern.permute.xlu1 %v2783_v2  ;;  %v3054_v34 = vpop.trf.xlu0 }
 0x11f   : > { %484 = vperm.xlu1 %2589, %v354_v15  }
 0x121   : > { %524 = vperm.xlu0 %2612, %v3035_v31  }
 0x123   : > { %2590 = vset.pattern.permute.xlu1 %v2785_v6 }
 0x124   : > { %584 = vperm.xlu1 %2590, %v354_v15  }
 0x125   : > { %2616 = vset.pattern.permute.xlu0 %v2785_v6 }
 0x126   : > { %624 = vperm.xlu0 %2616, %v3035_v31  }
 0x128   : > { %2591 = vset.pattern.permute.xlu1 %v2784_v3 }
 0x129   : > { %394 = vperm.xlu1 %2591, %v355_v19  }
 0x12d   : > { %2592 = vset.pattern.permute.xlu1 %v2783_v2 }
 0x12e   : > { %488 = vperm.xlu1 %2592, %v355_v19  }
 0x132   : > { %2593 = vset.pattern.permute.xlu1 %v2785_v6 }
 0x133   : > { %588 = vperm.xlu1 %2593, %v355_v19  }
 0x137   : > { %2594 = vset.pattern.permute.xlu1 %v2784_v3 }
 0x138   : > { %399 = vperm.xlu1 %2594, %v356_v23  }
 0x13c   : > { %2595 = vset.pattern.permute.xlu1 %v2783_v2 }
 0x13d   : > { %492 = vperm.xlu1 %2595, %v356_v23  }
 0x141   : > { %2596 = vset.pattern.permute.xlu1 %v2785_v6 }
 0x142   : > { %592 = vperm.xlu1 %2596, %v356_v23  }
 0x146   : > { %2597 = vset.pattern.permute.xlu1 %v2784_v3 }
 0x147   : > { %404 = vperm.xlu1 %2597, %v357_v24  }
 0x14b   : > { %2598 = vset.pattern.permute.xlu1 %v2783_v2 }
 0x14c   : > { %496 = vperm.xlu1 %2598, %v357_v24  }
 0x150   : > { %2599 = vset.pattern.permute.xlu1 %v2785_v6 }
 0x151   : > { %596 = vperm.xlu1 %2599, %v357_v24  }
 0x155   : > { %2600 = vset.pattern.permute.xlu1 %v2784_v3 }
 0x156   : > { %409 = vperm.xlu1 %2600, %v358_v25  }
 0x15a   : > { %2601 = vset.pattern.permute.xlu1 %v2783_v2 }
 0x15b   : > { %500 = vperm.xlu1 %2601, %v358_v25  }
 0x15f   : > { %2602 = vset.pattern.permute.xlu1 %v2784_v3 }
 0x160   : > { %414 = vperm.xlu1 %2602, %v3014_v26  }
 0x162   : > { %v469_v41 = vpop.permute.xlu1 %468  ;;  %v370_v42 = vpop.permute.xlu0 %369 }
 0x163   : > { %v535_v43 = vmul.f32 %v3062_v38, %v469_v41  ;;  %v451_v44 = vmul.f32 %v3066_v39, %v370_v42  ;;  %v942_v42 = vld [vmem:[#allocation5 + $0x58] sm:$0xff] }
 0x164   : > { %2603 = vset.pattern.permute.xlu1 %v2783_v2 }
 0x165   : > { %504 = vperm.xlu1 %2603, %v3014_v26   ;;  %v551_v47 = vadd.f32 %v535_v43, %v451_v44  ;;  %v931_v43 = vld [vmem:[#allocation5] sm:$0xff] }
 0x167   : > { %v569_v46 = vpop.permute.xlu1 %568 }
 0x168   : > { %v635_v48 = vmul.f32 %v3074_v45, %v569_v46  ;;  %v2364_v46 = vpack.c.bf16 %v942_v42, %v934_v37 }
 0x169   : > { %2604 = vset.pattern.permute.xlu1 %v2785_v6 }
 0x16a   : > { %v651_v50 = vadd.f32 %v635_v48, %v551_v47  ;;  %604 = vperm.xlu1 %2604, %v3014_v26   ;;  %v933_v47 = vld [vmem:[#allocation5 + $0x10] sm:$0xff]  ;;  %2365 = vmatprep.subr.bf16.mxu0 %v2364_v46 }
 0x16b   : > { %v941_v48 = vld [vmem:[#allocation5 + $0x50] sm:$0xff] }
 0x16c   : > { %v375_v51 = vpop.permute.xlu1 %374  ;;  %v674_v52 = vadd.f32 %v3082_v49, %v651_v50  ;;  %v948_v50 = vld [vmem:[#allocation5 + $0x88] sm:$0xff]  ;;  %v997_v46 = vld [vmem:[#allocation5 + $0x210] sm:$0xff] }
 0x16d   : > { %v452_v56 = vmul.f32 %v3066_v39, %v375_v51  ;;  %v2366_v51 = vpack.c.bf16 %v941_v48, %v933_v47  ;;  %v1005_v48 = vld [vmem:[#allocation5 + $0x250] sm:$0xff] }
 0x16e   : > { %2605 = vset.pattern.permute.xlu1 %v2784_v3  ;;  %v690_v53 = vmax.f32 %v674_v52, 0.0  ;;  %v956_v52 = vld [vmem:[#allocation5 + $0xc8] sm:$0xff] }
 0x16f   : > { %419 = vperm.xlu1 %2605, %v3017_v27  }
 0x170   : > { %2292 = vmatprep.mubr.msk.f32.mxu0 %vm721_vm0, %v690_v53  ;;  %v950_v53 = vld [vmem:[#allocation5 + $0x98] sm:$0xff] }
 0x171   : > { %v473_v54 = vpop.permute.xlu1 %472 }
 0x172   : > { %v536_v55 = vmul.f32 %v3062_v38, %v473_v54  ;;  %v958_v54 = vld [vmem:[#allocation5 + $0xd8] sm:$0xff] }
 0x173   : > { %424 = vperm.xlu1 %2605, %v3020_v28  }
 0x174   : > { %v552_v58 = vadd.f32 %v536_v55, %v452_v56  ;;  %v2336_v56 = vpack.c.bf16 %v956_v52, %v948_v50  ;;  %v1012_v50 = vld [vmem:[#allocation5 + $0x288] sm:$0xff]  ;;  %v1014_v52 = vld [vmem:[#allocation5 + $0x298] sm:$0xff] }
 0x176   : > { %v573_v57 = vpop.permute.xlu1 %572 }
 0x177   : > { %v636_v59 = vmul.f32 %v3074_v45, %v573_v57  ;;  %2608 = vset.pattern.permute.xlu1 %v2783_v2  ;;  %v2368_v57 = vpack.c.bf16 %v958_v54, %v950_v53  ;;  %v1022_v53 = vld [vmem:[#allocation5 + $0x2d8] sm:$0xff] }
 0x178   : > { %512 = vperm.xlu1 %2608, %v3020_v28  }
 0x179   : > { %v652_v60 = vadd.f32 %v636_v59, %v552_v58  ;;  %v947_v58 = vld [vmem:[#allocation5 + $0x80] sm:$0xff] }
 0x17a   : > { %v955_v59 = vld [vmem:[#allocation5 + $0xc0] sm:$0xff] }
 0x17b   : > { %v675_v61 = vadd.f32 %v3082_v49, %v652_v60  ;;  %v380_v62 = vpop.permute.xlu1 %379  ;;  %v949_v60 = vld [vmem:[#allocation5 + $0x90] sm:$0xff] }
 0x17c   : > { %2609 = vset.pattern.permute.xlu1 %v2785_v6  ;;  %v453_v4 = vmul.f32 %v3066_v39, %v380_v62  ;;  %v957_v62 = vld [vmem:[#allocation5 + $0xd0] sm:$0xff] }
 0x17d   : > { %v691_v63 = vmax.f32 %v675_v61, 0.0  ;;  %612 = vperm.xlu1 %2609, %v3020_v28   ;;  %v2338_v61 = vpack.c.bf16 %v955_v59, %v947_v58  ;;  %v1011_v58 = vld [vmem:[#allocation5 + $0x280] sm:$0xff] }
 0x17e   : > { %v1019_v59 = vld [vmem:[#allocation5 + $0x2c0] sm:$0xff] }
 0x17f   : > { %2293 = vmatmul.mubr.msk.f32.vlgmr.msra.gmra.mrb[0].mxu0 %vm721_vm0, %v691_v63  ;;  %v964_v63 = vld [vmem:[#allocation5 + $0x108] sm:$0xff] }
 0x180   : > { %v477_v0 = vpop.permute.xlu1 %476  ;;  %2367 = vmatpush1.bf16.msra.mxu0 %v2366_v51  ;;  %v1020_v51 = vld [vmem:[#allocation5 + $0x2c8] sm:$0xff] }
 0x181   : > { %2610 = vset.pattern.permute.xlu1 %v2784_v3  ;;  %v537_v1 = vmul.f32 %v3062_v38, %v477_v0  ;;  %v972_v0 = vld [vmem:[#allocation5 + $0x148] sm:$0xff]  ;;  %2369 = vmatprep.subr.bf16.mxu0 %v2368_v57  ;;  %v2352_v57 = vpack.c.bf16 %v1020_v51, %v1012_v50 }
 0x182   : > { %429 = vperm.xlu1 %2610, %v3025_v29  }
 0x183   : > { %v553_v7 = vadd.f32 %v537_v1, %v453_v4  ;;  %v2370_v4 = vpack.c.bf16 %v957_v62, %v949_v60  ;;  %v1013_v60 = vld [vmem:[#allocation5 + $0x290] sm:$0xff] }
 0x184   : > { %v1021_v62 = vld [vmem:[#allocation5 + $0x2d0] sm:$0xff] }
 0x185   : > { %v577_v5 = vpop.permute.xlu1 %576  ;;  %2371 = vmatpush1.bf16.msra.mxu0 %v2370_v4  ;;  %v1030_v4 = vld [vmem:[#allocation5 + $0x318] sm:$0xff] }
 0x186   : > { %v637_v8 = vmul.f32 %v3074_v45, %v577_v5  ;;  %434 = vperm.xlu1 %2610, %v3030_v30   ;;  %v2340_v5 = vpack.c.bf16 %v972_v0, %v964_v63  ;;  %v1028_v63 = vld [vmem:[#allocation5 + $0x308] sm:$0xff] }
 0x187   : > { %v1036_v0 = vld [vmem:[#allocation5 + $0x348] sm:$0xff] }
 0x188   : > { %v653_v9 = vadd.f32 %v637_v8, %v553_v7  ;;  %v966_v7 = vld [vmem:[#allocation5 + $0x118] sm:$0xff] }
 0x189   : > { %v974_v8 = vld [vmem:[#allocation5 + $0x158] sm:$0xff] }
 0x18a   : > { %v676_v10 = vadd.f32 %v3082_v49, %v653_v9  ;;  %v385_v11 = vpop.permute.xlu1 %384  ;;  %2611 = vset.pattern.permute.xlu1 %v2783_v2  ;;  %v963_v9 = vld [vmem:[#allocation5 + $0x100] sm:$0xff] }
 0x18b   : > { %520 = vperm.xlu1 %2611, %v3030_v30   ;;  %v454_v15 = vmul.f32 %v3066_v39, %v385_v11  ;;  %v2372_v11 = vpack.c.bf16 %v974_v8, %v966_v7  ;;  %v2354_v7 = vpack.c.bf16 %v1019_v59, %v1011_v58 }
 0x18c   : > { %v692_v12 = vmax.f32 %v676_v10, 0.0 }
 0x18d   : > { %2373 = vmatprep.subr.bf16.mxu0 %v2372_v11  ;;  %v1027_v11 = vld [vmem:[#allocation5 + $0x300] sm:$0xff] }
 0x18e   : > { %2295 = vmatprep.mubr.msk.f32.mxu0 %vm721_vm0, %v692_v12  ;;  %v971_v12 = vld [vmem:[#allocation5 + $0x140] sm:$0xff] }
 0x18f   : > { %v481_v13 = vpop.permute.xlu1 %480  ;;  %2613 = vset.pattern.permute.xlu1 %v2785_v6 }
 0x190   : > { %620 = vperm.xlu1 %2613, %v3030_v30   ;;  %v538_v14 = vmul.f32 %v3062_v38, %v481_v13  ;;  %v965_v13 = vld [vmem:[#allocation5 + $0x110] sm:$0xff] }
 0x192   : > { %v554_v17 = vadd.f32 %v538_v14, %v454_v15  ;;  %v973_v14 = vld [vmem:[#allocation5 + $0x150] sm:$0xff] }
 0x194   : > { %v581_v16 = vpop.permute.xlu1 %580  ;;  %2614 = vset.pattern.permute.xlu1 %v2784_v3 }
 0x195   : > { %v638_v18 = vmul.f32 %v3074_v45, %v581_v16  ;;  %439 = vperm.xlu1 %2614, %v3035_v31   ;;  %v932_v31 = vld [vmem:[#allocation5 + $0x8] sm:$0xff] }
 0x196   : > { %v2332_v41 = vpack.c.bf16 %v940_v32, %v932_v31  ;;  %v1006_v31 = vld [vmem:[#allocation5 + $0x258] sm:$0xff] }
 0x197   : > { %v654_v19 = vadd.f32 %v638_v18, %v554_v17  ;;  %v2342_v17 = vpack.c.bf16 %v971_v12, %v963_v9  ;;  %v980_v18 = vld [vmem:[#allocation5 + $0x188] sm:$0xff]  ;;  %v2386_v9 = vpack.c.bf16 %v1021_v62, %v1013_v60  ;;  %v1035_v12 = vld [vmem:[#allocation5 + $0x340] sm:$0xff] }
 0x198   : > { %2333 = vmatprep.subr.bf16.mxu1 %v2332_v41 }
 0x199   : > { %v677_v20 = vadd.f32 %v3082_v49, %v654_v19  ;;  %v390_v21 = vpop.permute.xlu1 %389  ;;  %444 = vperm.xlu1 %2614, %v3054_v34   ;;  %v988_v19 = vld [vmem:[#allocation5 + $0x1c8] sm:$0xff] }
 0x19a   : > { %v455_v24 = vmul.f32 %v3066_v39, %v390_v21  ;;  %v2374_v21 = vpack.c.bf16 %v973_v14, %v965_v13 }
 0x19b   : > { %v693_v22 = vmax.f32 %v677_v20, 0.0  ;;  %v982_v20 = vld [vmem:[#allocation5 + $0x198] sm:$0xff] }
 0x19c   : > { %2375 = vmatpush1.bf16.msra.mxu0 %v2374_v21 }
 0x19d   : > { %2615 = vset.pattern.permute.xlu1 %v2783_v2  ;;  %2296 = vmatmul.mubr.msk.f32.gmra.mrb[2].mxu0 %vm721_vm0, %v693_v22  ;;  %v2344_v22 = vpack.c.bf16 %v988_v19, %v980_v18  ;;  %v2358_v19 = vpack.c.bf16 %v1035_v12, %v1027_v11 }
 0x19e   : > { %v485_v23 = vpop.permute.xlu1 %484  ;;  %528 = vperm.xlu1 %2615, %v3054_v34  }
 0x19f   : > { %v539_v3 = vmul.f32 %v3062_v38, %v485_v23  ;;  %v990_v23 = vld [vmem:[#allocation5 + $0x1d8] sm:$0xff] }
 0x1a1   : > { %v555_v26 = vadd.f32 %v539_v3, %v455_v24  ;;  %v979_v3 = vld [vmem:[#allocation5 + $0x180] sm:$0xff] }
 0x1a2   : > { %2617 = vset.pattern.permute.xlu1 %v2785_v6  ;;  %v939_v6 = vld [vmem:[#allocation5 + $0x40] sm:$0xff] }
 0x1a3   : > { %v585_v25 = vpop.permute.xlu1 %584  ;;  %628 = vperm.xlu1 %2617, %v3054_v34   ;;  %v2334_v34 = vpack.c.bf16 %v939_v6, %v931_v43  ;;  %v987_v24 = vld [vmem:[#allocation5 + $0x1c0] sm:$0xff] }
 0x1a4   : > { %v639_v27 = vmul.f32 %v3074_v45, %v585_v25  ;;  %v2346_v41 = vpack.c.bf16 %v987_v24, %v979_v3  ;;  %v995_v6 = vld [vmem:[#allocation5 + $0x200] sm:$0xff] }
 0x1a5   : > { %2335 = vmatpush1.bf16.msra.mxu1 %v2334_v34 }
 0x1a6   : > { %v655_v28 = vadd.f32 %v639_v27, %v555_v26  ;;  %2337 = vmatprep.subr.bf16.mxu1 %v2336_v56  ;;  %v2376_v26 = vpack.c.bf16 %v990_v23, %v982_v20  ;;  %v981_v27 = vld [vmem:[#allocation5 + $0x190] sm:$0xff]  ;;  %v2382_v56 = vpack.c.bf16 %v1005_v48, %v997_v46 }
 0x1a7   : > { %v1053_v46 = vld [vmem:[#allocation5 + $0x3d0] sm:$0xff] }
 0x1a8   : > { %v678_v2 = vadd.f32 %v3082_v49, %v655_v28  ;;  %v395_v29 = vpop.permute.xlu1 %394  ;;  %v989_v28 = vld [vmem:[#allocation5 + $0x1d0] sm:$0xff]  ;;  %2377 = vmatprep.subr.bf16.mxu0 %v2376_v26 }
 0x1a9   : > { %v456_v1 = vmul.f32 %v3066_v39, %v395_v29  ;;  %2339 = vmatpush1.bf16.msra.mxu1 %v2338_v61  ;;  %v1004_v29 = vld [vmem:[#allocation5 + $0x248] sm:$0xff]  ;;  %v2378_v42 = vpack.c.bf16 %v989_v28, %v981_v27  ;;  %v2384_v61 = vpack.c.bf16 %v1022_v53, %v1014_v52  ;;  %v2786_v53 = vmov 0.0  }
 0x1aa   : > { %v694_v30 = vmax.f32 %v678_v2, 0.0  ;;  %2341 = vmatprep.subr.bf16.mxu1 %v2340_v5  ;;  %v996_v2 = vld [vmem:[#allocation5 + $0x208] sm:$0xff]  ;;  %v1038_v5 = vld [vmem:[#allocation5 + $0x358] sm:$0xff]  ;;  %1165 = vmatprep.mubr.f32.mxu1 %v2786_v53 }
 0x1ab   : > { %v2348_v43 = vpack.c.bf16 %v1004_v29, %v996_v2  ;;  %2379 = vmatpush1.bf16.msra.mxu0 %v2378_v42  ;;  %v2388_v14 = vpack.c.bf16 %v1038_v5, %v1030_v4  ;;  %v1044_v29 = vld [vmem:[#allocation5 + $0x388] sm:$0xff] }
 0x1ac   : > { %2298 = vmatprep.mubr.msk.f32.mxu0 %vm721_vm0, %v694_v30  ;;  %v998_v30 = vld [vmem:[#allocation5 + $0x218] sm:$0xff] }
 0x1ad   : > { %v489_v44 = vpop.permute.xlu1 %488  ;;  %2343 = vmatpush1.bf16.msra.mxu1 %v2342_v17  ;;  %v2380_v47 = vpack.c.bf16 %v1006_v31, %v998_v30  ;;  %v1052_v30 = vld [vmem:[#allocation5 + $0x3c8] sm:$0xff]  ;;  %v1046_v31 = vld [vmem:[#allocation5 + $0x398] sm:$0xff] }
 0x1ae   : > { %v540_v55 = vmul.f32 %v3062_v38, %v489_v44  ;;  %2345 = vmatprep.subr.bf16.mxu1 %v2344_v22  ;;  %v1003_v44 = vld [vmem:[#allocation5 + $0x240] sm:$0xff] }
 0x1af   : > { %v2350_v54 = vpack.c.bf16 %v1003_v44, %v995_v6  ;;  %2381 = vmatprep.subr.bf16.mxu0 %v2380_v47  ;;  %v1051_v6 = vld [vmem:[#allocation5 + $0x3c0] sm:$0xff]  ;;  %v1045_v44 = vld [vmem:[#allocation5 + $0x390] sm:$0xff] }
 0x1b0   : > { %v556_v15 = vadd.f32 %v540_v55, %v456_v1  ;;  %2383 = vmatpush1.bf16.msra.mxu0 %v2382_v56  ;;  %v2394_v48 = vpack.c.bf16 %v1053_v46, %v1045_v44 }
 0x1b1   : > { %2347 = vmatpush1.bf16.msra.mxu1 %v2346_v41  ;;  %2385 = vmatprep.subr.bf16.mxu0 %v2384_v61  ;;  %v1043_v41 = vld [vmem:[#allocation5 + $0x380] sm:$0xff] }
 0x1b2   : > { %v589_v10 = vpop.permute.xlu1 %588  ;;  %2349 = vmatprep.subr.bf16.mxu1 %v2348_v43  ;;  %v2362_v47 = vpack.c.bf16 %v1051_v6, %v1043_v41 }
 0x1b3   : > { %v640_v16 = vmul.f32 %v3074_v45, %v589_v10  ;;  %v2356_v10 = vpack.c.bf16 %v1036_v0, %v1028_v63 }
 0x1b4   : > { %2387 = vmatpush1.bf16.msra.mxu0 %v2386_v9 }
 0x1b5   : > { %v656_v25 = vadd.f32 %v640_v16, %v556_v15  ;;  %2351 = vmatpush1.bf16.msra.mxu1 %v2350_v54  ;;  %v1029_v15 = vld [vmem:[#allocation5 + $0x310] sm:$0xff]  ;;  %2389 = vmatprep.subr.bf16.mxu0 %v2388_v14 }
 0x1b6   : > { %2353 = vmatprep.subr.bf16.mxu1 %v2352_v57  ;;  %v1037_v16 = vld [vmem:[#allocation5 + $0x350] sm:$0xff] }
 0x1b7   : > { %v679_v32 = vadd.f32 %v3082_v49, %v656_v25  ;;  %v400_v37 = vpop.permute.xlu1 %399  ;;  %v2390_v21 = vpack.c.bf16 %v1037_v16, %v1029_v15 }
 0x1b8   : > { %v457_v8 = vmul.f32 %v3066_v39, %v400_v37  ;;  %v1054_v37 = vld [vmem:[#allocation5 + $0x3d8] sm:$0xff] }
 0x1b9   : > { %v695_v34 = vmax.f32 %v679_v32, 0.0  ;;  %2355 = vmatpush1.bf16.msra.mxu1 %v2354_v7  ;;  %2391 = vmatpush1.bf16.msra.mxu0 %v2390_v21  ;;  %v2360_v32 = vpack.c.bf16 %v1052_v30, %v1044_v29  ;;  %v2392_v43 = vpack.c.bf16 %v1054_v37, %v1046_v31 }
 0x1ba   : > { %2357 = vmatprep.subr.bf16.mxu1 %v2356_v10 }
 0x1bb   : > { %2299 = vmatmul.mubr.msk.f32.gmra.mrb[4].mxu0 %vm721_vm0, %v695_v34  ;;  %v509_v34 = vpop.permute.xlu0 %508  ;;  %2393 = vmatprep.subr.bf16.mxu0 %v2392_v43 }
 0x1bc   : > { %v493_v55 = vpop.permute.xlu1 %492  ;;  %v545_v10 = vmul.f32 %v3062_v38, %v509_v34 }
 0x1bd   : > { %v541_v1 = vmul.f32 %v3062_v38, %v493_v55  ;;  %2359 = vmatpush1.bf16.msra.mxu1 %v2358_v19  ;;  %2395 = vmatpush1.bf16.msra.mxu0 %v2394_v48 }
 0x1be   : > { %2361 = vmatprep.subr.bf16.mxu1 %v2360_v32 }
 0x1bf   : > { %v557_v17 = vadd.f32 %v541_v1, %v457_v8  ;;  %v601_v54 = vpop.permute.xlu0 %600 }
 0x1c0   : > { %v643_v58 = vmul.f32 %v3074_v45, %v601_v54 }
 0x1c1   : > { %v593_v13 = vpop.permute.xlu1 %592  ;;  %2363 = vmatpush1.bf16.msra.mxu1 %v2362_v47 }
 0x1c2   : > { %v641_v18 = vmul.f32 %v3074_v45, %v593_v13 }
 0x1c3   : > { %v609_v13 = vpop.permute.xlu0 %608 }
 0x1c4   : > { %v657_v20 = vadd.f32 %v641_v18, %v557_v17  ;;  %v645_v17 = vmul.f32 %v3074_v45, %v609_v13 }
 0x1c6   : > { %v680_v22 = vadd.f32 %v3082_v49, %v657_v20  ;;  %v405_v23 = vpop.permute.xlu1 %404 }
 0x1c7   : > { %v458_v26 = vmul.f32 %v3066_v39, %v405_v23  ;;  %v617_v23 = vpop.permute.xlu0 %616 }
 0x1c8   : > { %v696_v3 = vmax.f32 %v680_v22, 0.0  ;;  %v647_v41 = vmul.f32 %v3074_v45, %v617_v23 }
 0x1ca   : > { %2301 = vmatprep.mubr.msk.f32.mxu0 %vm721_vm0, %v696_v3 }
 0x1cb   : > { %v497_v24 = vpop.permute.xlu1 %496 }
 0x1cc   : > { %v542_v25 = vmul.f32 %v3062_v38, %v497_v24 }
 0x1ce   : > { %v558_v28 = vadd.f32 %v542_v25, %v458_v26 }
 0x1d0   : > { %v597_v27 = vpop.permute.xlu1 %596 }
 0x1d1   : > { %v642_v2 = vmul.f32 %v3074_v45, %v597_v27 }
 0x1d3   : > { %v658_v42 = vadd.f32 %v642_v2, %v558_v28  ;;  %v517_v28 = vpop.permute.xlu0 %516 }
 0x1d4   : > { %v547_v29 = vmul.f32 %v3062_v38, %v517_v28 }
 0x1d5   : > { %v681_v50 = vadd.f32 %v3082_v49, %v658_v42  ;;  %v410_v51 = vpop.permute.xlu1 %409 }
 0x1d6   : > { %v459_v56 = vmul.f32 %v3066_v39, %v410_v51 }
 0x1d7   : > { %v697_v52 = vmax.f32 %v681_v50, 0.0  ;;  %v525_v50 = vpop.permute.xlu0 %524 }
 0x1d9   : > { %2302 = vmatmul.mubr.msk.f32.gmra.mrb[6].mxu0 %vm721_vm0, %v697_v52 }
 0x1da   : > { %v501_v55 = vpop.permute.xlu1 %500 }
 0x1db   : > { %v543_v57 = vmul.f32 %v3062_v38, %v501_v55 }
 0x1dd   : > { %v559_v59 = vadd.f32 %v543_v57, %v459_v56  ;;  %v549_v56 = vmul.f32 %v3062_v38, %v525_v50  ;;  %v953_v50 = vld [vmem:[#allocation5 + $0xb0] sm:$0xff] }
 0x1df   : > { %v659_v60 = vadd.f32 %v643_v58, %v559_v59  ;;  %v415_v61 = vpop.permute.xlu1 %414  ;;  %v625_v59 = vpop.permute.xlu0 %624 }
 0x1e0   : > { %v460_v4 = vmul.f32 %v3066_v39, %v415_v61 }
 0x1e1   : > { %v682_v62 = vadd.f32 %v3082_v49, %v659_v60 }
 0x1e3   : > { %v698_v63 = vmax.f32 %v682_v62, 0.0 }
 0x1e4   : > { %v505_v0 = vpop.permute.xlu1 %504 }
 0x1e5   : > { %2304 = vmatprep.mubr.msk.f32.mxu0 %vm721_vm0, %v698_v63  ;;  %v544_v1 = vmul.f32 %v3062_v38, %v505_v0  ;;  %v649_v63 = vmul.f32 %v3074_v45, %v625_v59  ;;  %v991_v59 = vld [vmem:[#allocation5 + $0x1e0] sm:$0xff] }
 0x1e7   : > { %v560_v7 = vadd.f32 %v544_v1, %v460_v4 }
 0x1e9   : > { %v605_v5 = vpop.permute.xlu1 %604 }
 0x1ea   : > { %v644_v8 = vmul.f32 %v3074_v45, %v605_v5 }
 0x1ec   : > { %v660_v9 = vadd.f32 %v644_v8, %v560_v7 }
 0x1ee   : > { %v683_v11 = vadd.f32 %v3082_v49, %v660_v9  ;;  %v420_v12 = vpop.permute.xlu1 %419 }
 0x1ef   : > { %v461_v14 = vmul.f32 %v3066_v39, %v420_v12 }
 0x1f0   : > { %v699_v15 = vmax.f32 %v683_v11, 0.0 }
 0x1f1   : > { %v561_v16 = vadd.f32 %v545_v10, %v461_v14 }
 0x1f2   : > { %v425_v18 = vpop.permute.xlu1 %424  ;;  %2305 = vmatmul.mubr.msk.f32.gmra.mrb[8].mxu0 %vm721_vm0, %v699_v15 }
 0x1f3   : > { %v661_v19 = vadd.f32 %v645_v17, %v561_v16  ;;  %v462_v24 = vmul.f32 %v3066_v39, %v425_v18  ;;  %v936_v16 = vld [vmem:[#allocation5 + $0x28] sm:$0xff] }
 0x1f4   : > { %v944_v17 = vld [vmem:[#allocation5 + $0x68] sm:$0xff] }
 0x1f5   : > { %v684_v20 = vadd.f32 %v3082_v49, %v661_v19  ;;  %v2396_v18 = vpack.c.bf16 %v944_v17, %v936_v16  ;;  %v946_v19 = vld [vmem:[#allocation5 + $0x78] sm:$0xff]  ;;  %v993_v16 = vld [vmem:[#allocation5 + $0x1f0] sm:$0xff] }
 0x1f7   : > { %v700_v21 = vmax.f32 %v684_v20, 0.0  ;;  %v513_v22 = vpop.permute.xlu1 %512  ;;  %2397 = vmatprep.subr.bf16.mxu1 %v2396_v18 }
 0x1f8   : > { %v546_v3 = vmul.f32 %v3062_v38, %v513_v22  ;;  %v943_v22 = vld [vmem:[#allocation5 + $0x60] sm:$0xff] }
 0x1f9   : > { %2307 = vmatprep.mubr.msk.f32.mxu0 %vm721_vm0, %v700_v21  ;;  %v935_v21 = vld [vmem:[#allocation5 + $0x20] sm:$0xff] }
 0x1fa   : > { %v562_v26 = vadd.f32 %v546_v3, %v462_v24  ;;  %v952_v3 = vld [vmem:[#allocation5 + $0xa8] sm:$0xff] }
 0x1fb   : > { %v960_v24 = vld [vmem:[#allocation5 + $0xe8] sm:$0xff] }
 0x1fc   : > { %v613_v25 = vpop.permute.xlu1 %612  ;;  %v2400_v28 = vpack.c.bf16 %v960_v24, %v952_v3 }
 0x1fd   : > { %v646_v27 = vmul.f32 %v3074_v45, %v613_v25 }
 0x1ff   : > { %v662_v2 = vadd.f32 %v646_v27, %v562_v26  ;;  %v2398_v27 = vpack.c.bf16 %v943_v22, %v935_v21  ;;  %v1015_v22 = vld [vmem:[#allocation5 + $0x2a0] sm:$0xff] }
 0x201   : > { %v685_v30 = vadd.f32 %v3082_v49, %v662_v2  ;;  %v430_v31 = vpop.permute.xlu1 %429  ;;  %v951_v2 = vld [vmem:[#allocation5 + $0xa0] sm:$0xff] }
 0x202   : > { %v463_v32 = vmul.f32 %v3066_v39, %v430_v31 }
 0x203   : > { %v701_v37 = vmax.f32 %v685_v30, 0.0 }
 0x204   : > { %v563_v42 = vadd.f32 %v547_v29, %v463_v32  ;;  %v959_v29 = vld [vmem:[#allocation5 + $0xe0] sm:$0xff]  ;;  %v937_v32 = vld [vmem:[#allocation5 + $0x30] sm:$0xff] }
 0x205   : > { %v435_v43 = vpop.permute.xlu1 %434  ;;  %2308 = vmatmul.mubr.msk.f32.gmra.mrb[10].mxu0 %vm721_vm0, %v701_v37  ;;  %v2402_v31 = vpack.c.bf16 %v959_v29, %v951_v2  ;;  %v945_v37 = vld [vmem:[#allocation5 + $0x70] sm:$0xff] }
 0x206   : > { %v663_v6 = vadd.f32 %v647_v41, %v563_v42  ;;  %v464_v48 = vmul.f32 %v3066_v39, %v435_v43  ;;  %v3205_v41 = vpack.c.bf16 %v945_v37, %v937_v32  ;;  %v968_v42 = vld [vmem:[#allocation5 + $0x128] sm:$0xff]  ;;  %v1001_v2 = vld [vmem:[#allocation5 + $0x230] sm:$0xff] }
 0x207   : > { %v976_v43 = vld [vmem:[#allocation5 + $0x168] sm:$0xff] }
 0x208   : > { %v686_v44 = vadd.f32 %v3082_v49, %v663_v6  ;;  %v967_v6 = vld [vmem:[#allocation5 + $0x120] sm:$0xff]  ;;  %v1032_v32 = vld [vmem:[#allocation5 + $0x328] sm:$0xff] }
 0x209   : > { %v1040_v37 = vld [vmem:[#allocation5 + $0x368] sm:$0xff] }
 0x20a   : > { %v702_v46 = vmax.f32 %v686_v44, 0.0  ;;  %v521_v34 = vpop.permute.xlu1 %520  ;;  %v2404_v44 = vpack.c.bf16 %v976_v43, %v968_v42  ;;  %v2420_v43 = vpack.c.bf16 %v1040_v37, %v1032_v32 }
 0x20b   : > { %v548_v47 = vmul.f32 %v3062_v38, %v521_v34 }
 0x20c   : > { %2310 = vmatprep.mubr.msk.f32.mxu0 %vm721_vm0, %v702_v46  ;;  %v975_v46 = vld [vmem:[#allocation5 + $0x160] sm:$0xff] }
 0x20d   : > { %v564_v52 = vadd.f32 %v548_v47, %v464_v48  ;;  %v2406_v34 = vpack.c.bf16 %v975_v46, %v967_v6  ;;  %v954_v47 = vld [vmem:[#allocation5 + $0xb8] sm:$0xff]  ;;  %v1031_v6 = vld [vmem:[#allocation5 + $0x320] sm:$0xff] }
 0x20e   : > { %v962_v48 = vld [vmem:[#allocation5 + $0xf8] sm:$0xff] }
 0x20f   : > { %v621_v51 = vpop.permute.xlu1 %620 }
 0x210   : > { %v648_v54 = vmul.f32 %v3074_v45, %v621_v51  ;;  %v3210_v51 = vpack.c.bf16 %v962_v48, %v954_v47  ;;  %v1018_v47 = vld [vmem:[#allocation5 + $0x2b8] sm:$0xff] }
 0x211   : > { %v1026_v48 = vld [vmem:[#allocation5 + $0x2f8] sm:$0xff] }
 0x212   : > { %v664_v55 = vadd.f32 %v648_v54, %v564_v52  ;;  %v961_v52 = vld [vmem:[#allocation5 + $0xf0] sm:$0xff] }
 0x213   : > { %v3212_v54 = vpack.c.bf16 %v961_v52, %v953_v50  ;;  %v3248_v50 = vpack.c.bf16 %v1026_v48, %v1018_v47  ;;  %v1017_v52 = vld [vmem:[#allocation5 + $0x2b0] sm:$0xff] }
 0x214   : > { %v687_v57 = vadd.f32 %v3082_v49, %v664_v55  ;;  %v440_v58 = vpop.permute.xlu1 %439  ;;  %v984_v55 = vld [vmem:[#allocation5 + $0x1a8] sm:$0xff] }
 0x215   : > { %v465_v60 = vmul.f32 %v3066_v39, %v440_v58 }
 0x216   : > { %v703_v61 = vmax.f32 %v687_v57, 0.0  ;;  %v983_v57 = vld [vmem:[#allocation5 + $0x1a0] sm:$0xff] }
 0x217   : > { %v565_v62 = vadd.f32 %v549_v56, %v465_v60  ;;  %v992_v56 = vld [vmem:[#allocation5 + $0x1e8] sm:$0xff]  ;;  %v970_v60 = vld [vmem:[#allocation5 + $0x138] sm:$0xff] }
 0x218   : > { %v445_v0 = vpop.permute.xlu1 %444  ;;  %2311 = vmatmul.mubr.msk.f32.gmra.mrb[12].mxu0 %vm721_vm0, %v703_v61  ;;  %v2408_v58 = vpack.c.bf16 %v992_v56, %v984_v55  ;;  %v978_v61 = vld [vmem:[#allocation5 + $0x178] sm:$0xff]  ;;  %v1025_v55 = vld [vmem:[#allocation5 + $0x2f0] sm:$0xff] }
 0x219   : > { %v665_v1 = vadd.f32 %v649_v63, %v565_v62  ;;  %v466_v9 = vmul.f32 %v3066_v39, %v445_v0  ;;  %v3188_v39 = vld [vmem:[%s3680_s4] ss:$0 sm:$0xff]  ;;  %v2410_v62 = vpack.c.bf16 %v991_v59, %v983_v57  ;;  %v3216_v63 = vpack.c.bf16 %v978_v61, %v970_v60  ;;  %v969_v0 = vld [vmem:[#allocation5 + $0x130] sm:$0xff]  ;;  %v1048_v59 = vld [vmem:[#allocation5 + $0x3a8] sm:$0xff] }
 0x21a   : > { %v3250_v56 = vpack.c.bf16 %v1025_v55, %v1017_v52  ;;  %v1034_v57 = vld [vmem:[#allocation5 + $0x338] sm:$0xff]  ;;  %v1056_v60 = vld [vmem:[#allocation5 + $0x3e8] sm:$0xff] }
 0x21b   : > { %v688_v4 = vadd.f32 %v3082_v49, %v665_v1  ;;  %v977_v1 = vld [vmem:[#allocation5 + $0x170] sm:$0xff] }
 0x21d   : > { %v704_v5 = vmax.f32 %v688_v4, 0.0  ;;  %v529_v7 = vpop.permute.xlu1 %528  ;;  %v3218_v4 = vpack.c.bf16 %v977_v1, %v969_v0  ;;  %v2424_v0 = vpack.c.bf16 %v1056_v60, %v1048_v59  ;;  %v1041_v1 = vld [vmem:[#allocation5 + $0x370] sm:$0xff] }
 0x21e   : > { %v550_v8 = vmul.f32 %v3062_v38, %v529_v7  ;;  %v938_v38 = vld [vmem:[#allocation5 + $0x38] sm:$0xff]  ;;  %v1008_v7 = vld [vmem:[#allocation5 + $0x268] sm:$0xff] }
 0x21f   : > { %2313 = vmatprep.mubr.msk.f32.mxu0 %vm721_vm0, %v704_v5  ;;  %v1000_v5 = vld [vmem:[#allocation5 + $0x228] sm:$0xff] }
 0x220   : > { %v566_v11 = vadd.f32 %v550_v8, %v466_v9  ;;  %v2412_v8 = vpack.c.bf16 %v1008_v7, %v1000_v5  ;;  %v999_v9 = vld [vmem:[#allocation5 + $0x220] sm:$0xff] }
 0x221   : > { %v1047_v5 = vld [vmem:[#allocation5 + $0x3a0] sm:$0xff] }
 0x222   : > { %v629_v10 = vpop.permute.xlu1 %628  ;;  %v1055_v7 = vld [vmem:[#allocation5 + $0x3e0] sm:$0xff] }
 0x223   : > { %v650_v12 = vmul.f32 %v3074_v45, %v629_v10  ;;  %v3190_v45 = vpack.c.bf16 %v946_v19, %v938_v38  ;;  %v1007_v10 = vld [vmem:[#allocation5 + $0x260] sm:$0xff]  ;;  %v1016_v19 = vld [vmem:[#allocation5 + $0x2a8] sm:$0xff] }
 0x225   : > { %v666_v13 = vadd.f32 %v650_v12, %v566_v11  ;;  %2429 = vmatprep.subr.bf16.mxu0 %v3190_v45  ;;  %v986_v11 = vld [vmem:[#allocation5 + $0x1b8] sm:$0xff] }
 0x227   : > { %v689_v14 = vadd.f32 %v3082_v49, %v666_v13  ;;  %v2414_v13 = vpack.c.bf16 %v1007_v10, %v999_v9  ;;  %v2426_v9 = vpack.c.bf16 %v1055_v7, %v1047_v5  ;;  %v1050_v10 = vld [vmem:[#allocation5 + $0x3b8] sm:$0xff] }
 0x229   : > { %v705_v15 = vmax.f32 %v689_v14, 0.0  ;;  %v994_v14 = vld [vmem:[#allocation5 + $0x1f8] sm:$0xff] }
 0x22a   : > { %v3222_v18 = vpack.c.bf16 %v994_v14, %v986_v11  ;;  %v1058_v11 = vld [vmem:[#allocation5 + $0x3f8] sm:$0xff]  ;;  %v1057_v14 = vld [vmem:[#allocation5 + $0x3f0] sm:$0xff] }
 0x22b   : > { %2314 = vmatmul.mubr.msk.f32.gmra.mrb[14].mxu0 %vm721_vm0, %v705_v15  ;;  %v985_v15 = vld [vmem:[#allocation5 + $0x1b0] sm:$0xff] }
 0x22c   : > { %1326 = vmatprep.mubr.f32.mxu0 %v2786_v53  ;;  %v3224_v38 = vpack.c.bf16 %v993_v16, %v985_v15 }
 0x252   : > { %v2294_v20 = vpop.f32.mrb[0].mxu0 }
 0x253   : > { %v836_v49 = vpop.f32.mrb[1].mxu0  ;;  %v842_v25 = vadd.f32 %v2294_v20, %v3188_v39  ;;  %v1024_v20 = vld [vmem:[#allocation5 + $0x2e8] sm:$0xff] }
 0x254   : > { %v837_v23 = vadd.f32 %v3188_v39, %v836_v49  ;;  %v2416_v21 = vpack.c.bf16 %v1024_v20, %v1016_v19 }
 0x255   : > { %v3201_v30 = vmax.f32 %v842_v25, 0.0 }
 0x256   : > { %v3195_v26 = vmax.f32 %v837_v23, 0.0  ;;  %v1023_v23 = vld [vmem:[#allocation5 + $0x2e0] sm:$0xff] }
 0x257   : > { %v2418_v25 = vpack.c.bf16 %v1023_v23, %v1015_v22 }
 0x258   : > { %1166 = vmatmul.mubr.f32.vlgmr.msra.gmra.mrb[0].mxu1 %v3195_v26  ;;  %1327 = vmatmul.mubr.f32.vlgmr.msra.gmra.mrb[16].mxu0 %v3195_v26 }
 0x259   : > { %1171 = vmatprep.mubr.f32.mxu1 %v2786_v53  ;;  %1332 = vmatprep.mubr.f32.mxu0 %v2786_v53 }
 0x25a   : > { %2399 = vmatpush1.bf16.msra.mxu1 %v2398_v27  ;;  %2431 = vmatpush1.bf16.msra.mxu0 %v3205_v41  ;;  %v1002_v27 = vld [vmem:[#allocation5 + $0x238] sm:$0xff] }
 0x25b   : > { %2401 = vmatprep.subr.bf16.mxu1 %v2400_v28  ;;  %2433 = vmatprep.subr.bf16.mxu0 %v3210_v51  ;;  %v1010_v28 = vld [vmem:[#allocation5 + $0x278] sm:$0xff] }
 0x25c   : > { %1172 = vmatmul.mubr.f32.gmra.mrb[2].mxu1 %v3201_v30  ;;  %1333 = vmatmul.mubr.f32.gmra.mrb[18].mxu0 %v3201_v30  ;;  %v3234_v29 = vpack.c.bf16 %v1010_v28, %v1002_v27 }
 0x25d   : > { %1177 = vmatprep.mubr.f32.mxu1 %v2786_v53  ;;  %1338 = vmatprep.mubr.f32.mxu0 %v2786_v53 }
 0x25e   : > { %2403 = vmatpush1.bf16.msra.mxu1 %v2402_v31  ;;  %2435 = vmatpush1.bf16.msra.mxu0 %v3212_v54  ;;  %v1009_v31 = vld [vmem:[#allocation5 + $0x270] sm:$0xff] }
 0x25f   : > { %2405 = vmatprep.subr.bf16.mxu1 %v2404_v44  ;;  %2437 = vmatprep.subr.bf16.mxu0 %v3216_v63  ;;  %v3238_v42 = vpack.c.bf16 %v1009_v31, %v1001_v2  ;;  %v1039_v44 = vld [vmem:[#allocation5 + $0x360] sm:$0xff] }
 0x262   : > { %2407 = vmatpush1.bf16.msra.mxu1 %v2406_v34  ;;  %2439 = vmatpush1.bf16.msra.mxu0 %v3218_v4  ;;  %v2422_v34 = vpack.c.bf16 %v1039_v44, %v1031_v6 }
 0x263   : > { %2409 = vmatprep.subr.bf16.mxu1 %v2408_v58  ;;  %2441 = vmatprep.subr.bf16.mxu0 %v3222_v18  ;;  %v1042_v58 = vld [vmem:[#allocation5 + $0x378] sm:$0xff] }
 0x264   : > { %v3254_v61 = vpack.c.bf16 %v1042_v58, %v1034_v57 }
 0x266   : > { %2411 = vmatpush1.bf16.msra.mxu1 %v2410_v62  ;;  %2443 = vmatpush1.bf16.msra.mxu0 %v3224_v38  ;;  %v1033_v62 = vld [vmem:[#allocation5 + $0x330] sm:$0xff] }
 0x267   : > { %2413 = vmatprep.subr.bf16.mxu1 %v2412_v8  ;;  %2445 = vmatprep.subr.bf16.mxu0 %v3234_v29  ;;  %v3257_v8 = vpack.c.bf16 %v1041_v1, %v1033_v62 }
 0x26a   : > { %2415 = vmatpush1.bf16.msra.mxu1 %v2414_v13  ;;  %2447 = vmatpush1.bf16.msra.mxu0 %v3238_v42  ;;  %v1049_v13 = vld [vmem:[#allocation5 + $0x3b0] sm:$0xff] }
 0x26b   : > { %2417 = vmatprep.subr.bf16.mxu1 %v2416_v21  ;;  %2449 = vmatprep.subr.bf16.mxu0 %v3248_v50  ;;  %v3262_v15 = vpack.c.bf16 %v1057_v14, %v1049_v13 }
 0x26e   : > { %2419 = vmatpush1.bf16.msra.mxu1 %v2418_v25  ;;  %2451 = vmatpush1.bf16.msra.mxu0 %v3250_v56 }
 0x26f   : > { %2421 = vmatprep.subr.bf16.mxu1 %v2420_v43  ;;  %2453 = vmatprep.subr.bf16.mxu0 %v3254_v61 }
 0x270   : > { %v2297_v12 = vpop.f32.mrb[2].mxu0 }
 0x271   : > { %v846_v17 = vpop.f32.mrb[3].mxu0  ;;  %v852_v3 = vadd.f32 %v2297_v12, %v3188_v39  ;;  %v3260_v12 = vpack.c.bf16 %v1058_v11, %v1050_v10 }
 0x272   : > { %v847_v49 = vadd.f32 %v3188_v39, %v846_v17  ;;  %2423 = vmatpush1.bf16.msra.mxu1 %v2422_v34  ;;  %2455 = vmatpush1.bf16.msra.mxu0 %v3257_v8 }
 0x273   : > { %v3240_v46 = vmax.f32 %v852_v3, 0.0  ;;  %2425 = vmatprep.subr.bf16.mxu1 %v2424_v0  ;;  %2457 = vmatprep.subr.bf16.mxu0 %v3260_v12 }
 0x274   : > { %v3229_v24 = vmax.f32 %v847_v49, 0.0 }
 0x276   : > { %1178 = vmatmul.mubr.f32.gmra.mrb[4].mxu1 %v3229_v24  ;;  %1339 = vmatmul.mubr.f32.gmra.mrb[20].mxu0 %v3229_v24 }
 0x277   : > { %1183 = vmatprep.mubr.f32.mxu1 %v2786_v53  ;;  %1344 = vmatprep.mubr.f32.mxu0 %v2786_v53 }
 0x278   : > { %2427 = vmatpush1.bf16.msra.mxu1 %v2426_v9  ;;  %2459 = vmatpush1.bf16.msra.mxu0 %v3262_v15 }
 0x279   : > { %2460 = vmatprep.subr.bf16.mxu1 %v3190_v45 }
 0x27a   : > { %1184 = vmatmul.mubr.f32.gmra.mrb[6].mxu1 %v3240_v46  ;;  %1345 = vmatmul.mubr.f32.gmra.mrb[22].mxu0 %v3240_v46 }
 0x27b   : > { %1189 = vmatprep.mubr.f32.mxu1 %v2786_v53  ;;  %1350 = vmatprep.mubr.f32.mxu0 %v2786_v53 }
 0x28e   : > { %v2300_v16 = vpop.f32.mrb[4].mxu0 }
 0x28f   : > { %v856_v17 = vpop.f32.mrb[5].mxu0  ;;  %v862_v20 = vadd.f32 %v2300_v16, %v3188_v39 }
 0x290   : > { %v857_v19 = vadd.f32 %v3188_v39, %v856_v17 }
 0x291   : > { %v3275_v21 = vmax.f32 %v862_v20, 0.0 }
 0x292   : > { %v3269_v49 = vmax.f32 %v857_v19, 0.0 }
 0x294   : > { %1190 = vmatmul.mubr.f32.gmra.mrb[8].mxu1 %v3269_v49  ;;  %1351 = vmatmul.mubr.f32.gmra.mrb[24].mxu0 %v3269_v49 }
 0x295   : > { %1195 = vmatprep.mubr.f32.mxu1 %v2786_v53  ;;  %1356 = vmatprep.mubr.f32.mxu0 %v2786_v53 }
 0x298   : > { %1196 = vmatmul.mubr.f32.gmra.mrb[10].mxu1 %v3275_v21  ;;  %1357 = vmatmul.mubr.f32.gmra.mrb[26].mxu0 %v3275_v21 }
 0x299   : > { %1201 = vmatprep.mubr.f32.mxu1 %v2786_v53  ;;  %1362 = vmatprep.mubr.f32.mxu0 %v2786_v53 }
 0x2ac   : > { %v2303_v45 = vpop.f32.mrb[6].mxu0 }
 0x2ad   : > { %v866_v22 = vpop.f32.mrb[7].mxu0  ;;  %v872_v3 = vadd.f32 %v2303_v45, %v3188_v39 }
 0x2ae   : > { %v867_v23 = vadd.f32 %v3188_v39, %v866_v22 }
 0x2af   : > { %v3289_v27 = vmax.f32 %v872_v3, 0.0 }
 0x2b0   : > { %v3283_v25 = vmax.f32 %v867_v23, 0.0 }
 0x2b2   : > { %1202 = vmatmul.mubr.f32.gmra.mrb[12].mxu1 %v3283_v25  ;;  %1363 = vmatmul.mubr.f32.gmra.mrb[28].mxu0 %v3283_v25 }
 0x2b3   : > { %1207 = vmatprep.mubr.f32.mxu1 %v2786_v53  ;;  %1368 = vmatprep.mubr.f32.mxu0 %v2786_v53 }
 0x2b6   : > { %1208 = vmatmul.mubr.f32.gmra.mrb[14].mxu1 %v3289_v27  ;;  %1369 = vmatmul.mubr.f32.gmra.mrb[30].mxu0 %v3289_v27 }
 0x2b7   : > { %1213 = vmatprep.mubr.f32.mxu1 %v2786_v53  ;;  %1374 = vmatprep.mubr.f32.mxu0 %v2786_v53 }
 0x2c5   : > { %v2306_v28 = vpop.f32.mrb[8].mxu0 }
 0x2c6   : > { %v876_v2 = vpop.f32.mrb[9].mxu0  ;;  %v882_v32 = vadd.f32 %v2306_v28, %v3188_v39 }
 0x2c7   : > { %v877_v31 = vadd.f32 %v3188_v39, %v876_v2 }
 0x2c8   : > { %v3303_v43 = vmax.f32 %v882_v32, 0.0 }
 0x2c9   : > { %v3297_v37 = vmax.f32 %v877_v31, 0.0 }
 0x2cb   : > { %1214 = vmatmul.mubr.f32.gmra.mrb[16].mxu1 %v3297_v37  ;;  %1375 = vmatmul.mubr.f32.gmra.mrb[32].mxu0 %v3297_v37 }
 0x2cc   : > { %1219 = vmatprep.mubr.f32.mxu1 %v2786_v53  ;;  %1380 = vmatprep.mubr.f32.mxu0 %v2786_v53 }
 0x2cf   : > { %1220 = vmatmul.mubr.f32.gmra.mrb[18].mxu1 %v3303_v43  ;;  %1381 = vmatmul.mubr.f32.gmra.mrb[34].mxu0 %v3303_v43 }
 0x2d0   : > { %1225 = vmatprep.mubr.f32.mxu1 %v2786_v53  ;;  %1386 = vmatprep.mubr.f32.mxu0 %v2786_v53 }
 0x2d8   : > { %v2309_v6 = vpop.f32.mrb[10].mxu0 }
 0x2d9   : > { %v886_v44 = vpop.f32.mrb[11].mxu0  ;;  %v892_v47 = vadd.f32 %v2309_v6, %v3188_v39 }
 0x2da   : > { %v887_v34 = vadd.f32 %v3188_v39, %v886_v44 }
 0x2db   : > { %v3317_v52 = vmax.f32 %v892_v47, 0.0 }
 0x2dc   : > { %v3311_v48 = vmax.f32 %v887_v34, 0.0 }
 0x2de   : > { %1226 = vmatmul.mubr.f32.gmra.mrb[20].mxu1 %v3311_v48  ;;  %1387 = vmatmul.mubr.f32.gmra.mrb[36].mxu0 %v3311_v48 }
 0x2df   : > { %1231 = vmatprep.mubr.f32.mxu1 %v2786_v53  ;;  %1392 = vmatprep.mubr.f32.mxu0 %v2786_v53 }
 0x2e2   : > { %1232 = vmatmul.mubr.f32.gmra.mrb[22].mxu1 %v3317_v52  ;;  %1393 = vmatmul.mubr.f32.gmra.mrb[38].mxu0 %v3317_v52 }
 0x2e3   : > { %1237 = vmatprep.mubr.f32.mxu1 %v2786_v53  ;;  %1398 = vmatprep.mubr.f32.mxu0 %v2786_v53 }
 0x2eb   : > { %v2312_v55 = vpop.f32.mrb[12].mxu0 }
 0x2ec   : > { %v896_v57 = vpop.f32.mrb[13].mxu0  ;;  %v902_v59 = vadd.f32 %v2312_v55, %v3188_v39 }
 0x2ed   : > { %v897_v58 = vadd.f32 %v3188_v39, %v896_v57 }
 0x2ee   : > { %v3331_v62 = vmax.f32 %v902_v59, 0.0 }
 0x2ef   : > { %v3325_v60 = vmax.f32 %v897_v58, 0.0 }
 0x2f1   : > { %1238 = vmatmul.mubr.f32.gmra.mrb[24].mxu1 %v3325_v60  ;;  %1399 = vmatmul.mubr.f32.gmra.mrb[40].mxu0 %v3325_v60 }
 0x2f2   : > { %1243 = vmatprep.mubr.f32.mxu1 %v2786_v53  ;;  %1404 = vmatprep.mubr.f32.mxu0 %v2786_v53 }
 0x2f5   : > { %1244 = vmatmul.mubr.f32.gmra.mrb[26].mxu1 %v3331_v62  ;;  %1405 = vmatmul.mubr.f32.gmra.mrb[42].mxu0 %v3331_v62 }
 0x2f6   : > { %1249 = vmatprep.mubr.f32.mxu1 %v2786_v53  ;;  %1410 = vmatprep.mubr.f32.mxu0 %v2786_v53 }
 0x2fe   : > { %v2315_v0 = vpop.f32.mrb[14].mxu0 }
 0x2ff   : > { %v906_v1 = vpop.f32.mrb[15].mxu0  ;;  %v912_v7 = vadd.f32 %v2315_v0, %v3188_v39 }
 0x300   : > { %v907_v5 = vadd.f32 %v3188_v39, %v906_v1  ;;  %v3395_v39 = vld [vmem:[%s3682_s6] sm:$0xff] }
 0x301   : > { %v3345_v10 = vmax.f32 %v912_v7, 0.0 }
 0x302   : > { %v3339_v9 = vmax.f32 %v907_v5, 0.0 }
 0x304   : > { %1250 = vmatmul.mubr.f32.gmra.mrb[28].mxu1 %v3339_v9  ;;  %1411 = vmatmul.mubr.f32.gmra.mrb[44].mxu0 %v3339_v9 }
 0x305   : > { %1255 = vmatprep.mubr.f32.mxu1 %v2786_v53  ;;  %1416 = vmatprep.mubr.f32.mxu0 %v2786_v53 }
 0x308   : > { %1256 = vmatmul.mubr.f32.gmra.mrb[30].mxu1 %v3345_v10  ;;  %1417 = vmatmul.mubr.f32.gmra.mrb[46].mxu0 %v3345_v10 }
 0x309   : > { %1487 = vmatprep.mubr.f32.mxu1 %v2786_v53  ;;  %1648 = vmatprep.mubr.f32.mxu0 %v2786_v53 }
 0x30c   : > { %1488 = vmatmul.mubr.f32.vlgmr.msra.gmra.mrb[32].mxu1 %v3195_v26  ;;  %1649 = vmatmul.mubr.f32.vlgmr.msra.gmra.mrb[48].mxu0 %v3195_v26  ;;  %v1075_v26 = vsub.s32 3, %v3051_v33 }
 0x30d   : > { %2468 = vmatpush1.bf16.msra.mxu1 %v3205_v41  ;;  %1493 = vmatprep.mubr.f32.mxu1 %v2786_v53  ;;  %v3411_v41 = vrot.slane %v3395_v39, %v633_v40 }
 0x30e   : > { %1654 = vmatprep.mubr.f32.mxu0 %v2786_v53  ;;  %2461 = vmatprep.subr.bf16.mxu1 %v3210_v51 }
 0x310   : > { %1494 = vmatmul.mubr.f32.gmra.mrb[34].mxu1 %v3201_v30  ;;  %1655 = vmatmul.mubr.f32.gmra.mrb[50].mxu0 %v3201_v30  ;;  %v3406_v30 = vrot.slane %v3395_v39, %v449_v36 }
 0x311   : > { %1499 = vmatprep.mubr.f32.mxu1 %v2786_v53  ;;  %1660 = vmatprep.mubr.f32.mxu0 %v2786_v53 }
 0x312   : > { %2469 = vmatpush1.bf16.msra.mxu1 %v3212_v54 }
 0x313   : > { %2462 = vmatprep.subr.bf16.mxu1 %v3216_v63  ;;  %v3417_v63 = vrot.slane %v3395_v39, %v533_v35 }
 0x314   : > { %1500 = vmatmul.mubr.f32.gmra.mrb[36].mxu1 %v3229_v24  ;;  %1661 = vmatmul.mubr.f32.gmra.mrb[52].mxu0 %v3229_v24 }
 0x315   : > { %1505 = vmatprep.mubr.f32.mxu1 %v2786_v53  ;;  %1666 = vmatprep.mubr.f32.mxu0 %v2786_v53 }
 0x316   : > { %2470 = vmatpush1.bf16.msra.mxu1 %v3218_v4  ;;  %v3420_v4 = vrot.slane %v3395_v39, %v1075_v26 }
 0x317   : > { %2463 = vmatprep.subr.bf16.mxu1 %v3222_v18 }
 0x318   : > { %1506 = vmatmul.mubr.f32.gmra.mrb[38].mxu1 %v3240_v46  ;;  %1667 = vmatmul.mubr.f32.gmra.mrb[54].mxu0 %v3240_v46 }
 0x319   : > { %1511 = vmatprep.mubr.f32.mxu1 %v2786_v53  ;;  %1672 = vmatprep.mubr.f32.mxu0 %v2786_v53 }
 0x31a   : > { %2471 = vmatpush1.bf16.msra.mxu1 %v3224_v38 }
 0x31b   : > { %2464 = vmatprep.subr.bf16.mxu1 %v3234_v29 }
 0x31c   : > { %1512 = vmatmul.mubr.f32.gmra.mrb[40].mxu1 %v3269_v49  ;;  %1673 = vmatmul.mubr.f32.gmra.mrb[56].mxu0 %v3269_v49 }
 0x31d   : > { %1517 = vmatprep.mubr.f32.mxu1 %v2786_v53  ;;  %1678 = vmatprep.mubr.f32.mxu0 %v2786_v53 }
 0x31e   : > { %2472 = vmatpush1.bf16.msra.mxu1 %v3238_v42 }
 0x31f   : > { %2465 = vmatprep.subr.bf16.mxu1 %v3248_v50 }
 0x320   : > { %1518 = vmatmul.mubr.f32.gmra.mrb[42].mxu1 %v3275_v21  ;;  %1679 = vmatmul.mubr.f32.gmra.mrb[58].mxu0 %v3275_v21 }
 0x321   : > { %1523 = vmatprep.mubr.f32.mxu1 %v2786_v53  ;;  %1684 = vmatprep.mubr.f32.mxu0 %v2786_v53 }
 0x322   : > { %2473 = vmatpush1.bf16.msra.mxu1 %v3250_v56 }
 0x323   : > { %2466 = vmatprep.subr.bf16.mxu1 %v3254_v61 }
 0x324   : > { %1524 = vmatmul.mubr.f32.gmra.mrb[44].mxu1 %v3283_v25  ;;  %1685 = vmatmul.mubr.f32.gmra.mrb[60].mxu0 %v3283_v25 }
 0x325   : > { %1529 = vmatprep.mubr.f32.mxu1 %v2786_v53  ;;  %1690 = vmatprep.mubr.f32.mxu0 %v2786_v53 }
 0x326   : > { %2474 = vmatpush1.bf16.msra.mxu1 %v3257_v8 }
 0x327   : > { %2467 = vmatprep.subr.bf16.mxu1 %v3260_v12 }
 0x328   : > { %1530 = vmatmul.mubr.f32.gmra.mrb[46].mxu1 %v3289_v27  ;;  %1691 = vmatmul.mubr.f32.gmra.mrb[62].mxu0 %v3289_v27 }
 0x329   : > { %1535 = vmatprep.mubr.f32.mxu1 %v2786_v53  ;;  %1696 = vmatprep.mubr.f32.mxu0 %v2786_v53 }
 0x32a   : > { %2475 = vmatpush1.bf16.msra.mxu1 %v3262_v15 }
 0x32b   : > { %v1167_v51 = vpop.f32.mrb[0].mxu1  ;;  %v1328_v54 = vpop.f32.mrb[16].mxu0 }
 0x32c   : > { %v1169_v18 = vpop.f32.mrb[1].mxu1  ;;  %v1330_v36 = vpop.f32.mrb[17].mxu0  ;;  %1536 = vmatmul.mubr.f32.gmra.mrb[48].mxu1 %v3297_v37  ;;  %1697 = vmatmul.mubr.f32.gmra.mrb[64].mxu0 %v3297_v37  ;;  %v1168_v40 = vadd.f32 %v1167_v51, %v3406_v30  ;;  %v1329_v38 = vadd.f32 %v1328_v54, %v3411_v41 }
 0x32d   : > { %1541 = vmatprep.mubr.f32.mxu1 %v2786_v53  ;;  %1702 = vmatprep.mubr.f32.mxu0 %v2786_v53  ;;  %v1170_v35 = vadd.f32 %v1169_v18, %v3417_v63  ;;  %v1331_v24 = vadd.f32 %v1330_v36, %v3420_v4 }
 0x32e   : > { %v1745_v12 = vmax.f32 %v1168_v40, 0.0  ;;  %v1747_v13 = vmax.f32 %v1329_v38, 0.0 }
 0x32f   : > { %v1173_v29 = vpop.f32.mrb[2].mxu1  ;;  %v1334_v42 = vpop.f32.mrb[18].mxu0  ;;  %v1746_v16 = vmax.f32 %v1170_v35, 0.0  ;;  %v1748_v17 = vmax.f32 %v1331_v24, 0.0 }
 0x330   : > { %v1174_v46 = vadd.f32 %v1173_v29, %v3406_v30  ;;  %v1335_v50 = vadd.f32 %v1334_v42, %v3411_v41  ;;  %v1175_v56 = vpop.f32.mrb[3].mxu1  ;;  %v1336_v61 = vpop.f32.mrb[19].mxu0  ;;  %1542 = vmatmul.mubr.f32.gmra.mrb[50].mxu1 %v3303_v43  ;;  %1703 = vmatmul.mubr.f32.gmra.mrb[66].mxu0 %v3303_v43 }
 0x331   : > { %v1176_v8 = vadd.f32 %v1175_v56, %v3417_v63  ;;  %v1337_v11 = vadd.f32 %v1336_v61, %v3420_v4  ;;  %1547 = vmatprep.mubr.f32.mxu1 %v2786_v53  ;;  %1708 = vmatprep.mubr.f32.mxu0 %v2786_v53 }
 0x332   : > { %v1753_v14 = vmax.f32 %v1174_v46, 0.0  ;;  %v1755_v15 = vmax.f32 %v1335_v50, 0.0 }
 0x333   : > { %v1754_v19 = vmax.f32 %v1176_v8, 0.0  ;;  %v1756_v20 = vmax.f32 %v1337_v11, 0.0 }
 0x334   : > { %v1874_v49 = vmax.f32 %v1745_v12, %v1753_v14  ;;  %v1916_v21 = vmax.f32 %v1747_v13, %v1755_v15  ;;  %1548 = vmatmul.mubr.f32.gmra.mrb[52].mxu1 %v3311_v48  ;;  %1709 = vmatmul.mubr.f32.gmra.mrb[68].mxu0 %v3311_v48 }
 0x335   : > { %v1895_v45 = vmax.f32 %v1746_v16, %v1754_v19  ;;  %v1937_v22 = vmax.f32 %v1748_v17, %v1756_v20  ;;  %1553 = vmatprep.mubr.f32.mxu1 %v2786_v53  ;;  %1714 = vmatprep.mubr.f32.mxu0 %v2786_v53 }
 0x338   : > { %1554 = vmatmul.mubr.f32.gmra.mrb[54].mxu1 %v3317_v52  ;;  %1715 = vmatmul.mubr.f32.gmra.mrb[70].mxu0 %v3317_v52 }
 0x339   : > { %1559 = vmatprep.mubr.f32.mxu1 %v2786_v53  ;;  %1720 = vmatprep.mubr.f32.mxu0 %v2786_v53 }
 0x33c   : > { %1560 = vmatmul.mubr.f32.gmra.mrb[56].mxu1 %v3325_v60  ;;  %1721 = vmatmul.mubr.f32.gmra.mrb[72].mxu0 %v3325_v60 }
 0x33d   : > { %1565 = vmatprep.mubr.f32.mxu1 %v2786_v53  ;;  %1726 = vmatprep.mubr.f32.mxu0 %v2786_v53 }
 0x340   : > { %1566 = vmatmul.mubr.f32.gmra.mrb[58].mxu1 %v3331_v62  ;;  %1727 = vmatmul.mubr.f32.gmra.mrb[74].mxu0 %v3331_v62 }
 0x341   : > { %1571 = vmatprep.mubr.f32.mxu1 %v2786_v53 }
 0x344   : > { %1572 = vmatmul.mubr.f32.gmra.mrb[60].mxu1 %v3339_v9 }
 0x345   : > { %1577 = vmatprep.mubr.f32.mxu1 %v2786_v53 }
 0x348   : > { %1578 = vmatmul.mubr.f32.gmra.mrb[62].mxu1 %v3345_v10 }
 0x349   : > { %v1179_v23 = vpop.f32.mrb[4].mxu1  ;;  %v1340_v3 = vpop.f32.mrb[20].mxu0  ;;  %1732 = vmatprep.mubr.f32.mxu1 %v2786_v53 }
 0x34a   : > { %v1180_v25 = vadd.f32 %v1179_v23, %v3406_v30  ;;  %v1341_v27 = vadd.f32 %v1340_v3, %v3411_v41  ;;  %v1181_v28 = vpop.f32.mrb[5].mxu1  ;;  %v1342_v2 = vpop.f32.mrb[21].mxu0 }
 0x34b   : > { %v1182_v31 = vadd.f32 %v1181_v28, %v3417_v63  ;;  %v1343_v32 = vadd.f32 %v1342_v2, %v3420_v4 }
 0x34c   : > { %v1761_v37 = vmax.f32 %v1180_v25, 0.0  ;;  %v1763_v43 = vmax.f32 %v1341_v27, 0.0  ;;  %1733 = vmatmul.mubr.f32.vlgmr.msra.gmra.mrb[64].mxu1 %v3339_v9 }
 0x34d   : > { %v1762_v6 = vmax.f32 %v1182_v31, 0.0  ;;  %v1764_v44 = vmax.f32 %v1343_v32, 0.0  ;;  %v1185_v34 = vpop.f32.mrb[6].mxu1  ;;  %v1346_v47 = vpop.f32.mrb[22].mxu0  ;;  %1738 = vmatprep.mubr.f32.mxu1 %v2786_v53 }
 0x34e   : > { %v1875_v48 = vmax.f32 %v1874_v49, %v1761_v37  ;;  %v1917_v52 = vmax.f32 %v1916_v21, %v1763_v43  ;;  %v1186_v55 = vadd.f32 %v1185_v34, %v3406_v30  ;;  %v1347_v57 = vadd.f32 %v1346_v47, %v3411_v41  ;;  %v1187_v58 = vpop.f32.mrb[7].mxu1  ;;  %v1348_v59 = vpop.f32.mrb[23].mxu0 }
 0x34f   : > { %v1896_v60 = vmax.f32 %v1895_v45, %v1762_v6  ;;  %v1938_v62 = vmax.f32 %v1937_v22, %v1764_v44  ;;  %v1188_v0 = vadd.f32 %v1187_v58, %v3417_v63  ;;  %v1349_v1 = vadd.f32 %v1348_v59, %v3420_v4 }
 0x350   : > { %v1769_v5 = vmax.f32 %v1186_v55, 0.0  ;;  %v1771_v7 = vmax.f32 %v1347_v57, 0.0  ;;  %1739 = vmatmul.mubr.f32.gmra.mrb[66].mxu1 %v3345_v10 }
 0x351   : > { %v1770_v9 = vmax.f32 %v1188_v0, 0.0  ;;  %v1772_v53 = vmax.f32 %v1349_v1, 0.0 }
 0x352   : > { %v1876_v26 = vmax.f32 %v1875_v48, %v1769_v5  ;;  %v1918_v51 = vmax.f32 %v1917_v52, %v1771_v7 }
 0x353   : > { %v1897_v54 = vmax.f32 %v1896_v60, %v1770_v9  ;;  %v1939_v18 = vmax.f32 %v1938_v62, %v1772_v53 }
 0x367   : > { %v1191_v36 = vpop.f32.mrb[8].mxu1  ;;  %v1352_v40 = vpop.f32.mrb[24].mxu0 }
 0x368   : > { %v1192_v38 = vadd.f32 %v1191_v36, %v3406_v30  ;;  %v1353_v35 = vadd.f32 %v1352_v40, %v3411_v41  ;;  %v1193_v24 = vpop.f32.mrb[9].mxu1  ;;  %v1354_v29 = vpop.f32.mrb[25].mxu0 }
 0x369   : > { %v1194_v42 = vadd.f32 %v1193_v24, %v3417_v63  ;;  %v1355_v46 = vadd.f32 %v1354_v29, %v3420_v4 }
 0x36a   : > { %v1777_v50 = vmax.f32 %v1192_v38, 0.0  ;;  %v1779_v10 = vmax.f32 %v1353_v35, 0.0 }
 0x36b   : > { %v1778_v56 = vmax.f32 %v1194_v42, 0.0  ;;  %v1780_v61 = vmax.f32 %v1355_v46, 0.0  ;;  %v1197_v8 = vpop.f32.mrb[10].mxu1  ;;  %v1358_v11 = vpop.f32.mrb[26].mxu0 }
 0x36c   : > { %v1877_v12 = vmax.f32 %v1876_v26, %v1777_v50  ;;  %v1919_v13 = vmax.f32 %v1918_v51, %v1779_v10  ;;  %v1198_v14 = vadd.f32 %v1197_v8, %v3406_v30  ;;  %v1359_v15 = vadd.f32 %v1358_v11, %v3411_v41  ;;  %v1199_v16 = vpop.f32.mrb[11].mxu1  ;;  %v1360_v17 = vpop.f32.mrb[27].mxu0 }
 0x36d   : > { %v1898_v19 = vmax.f32 %v1897_v54, %v1778_v56  ;;  %v1940_v20 = vmax.f32 %v1939_v18, %v1780_v61  ;;  %v1200_v49 = vadd.f32 %v1199_v16, %v3417_v63  ;;  %v1361_v21 = vadd.f32 %v1360_v17, %v3420_v4 }
 0x36e   : > { %v1785_v45 = vmax.f32 %v1198_v14, 0.0  ;;  %v1787_v22 = vmax.f32 %v1359_v15, 0.0 }
 0x36f   : > { %v1786_v23 = vmax.f32 %v1200_v49, 0.0  ;;  %v1788_v3 = vmax.f32 %v1361_v21, 0.0 }
 0x370   : > { %v1878_v25 = vmax.f32 %v1877_v12, %v1785_v45  ;;  %v1920_v27 = vmax.f32 %v1919_v13, %v1787_v22 }
 0x371   : > { %v1899_v28 = vmax.f32 %v1898_v19, %v1786_v23  ;;  %v1941_v2 = vmax.f32 %v1940_v20, %v1788_v3 }
 0x385   : > { %v1203_v31 = vpop.f32.mrb[12].mxu1  ;;  %v1364_v32 = vpop.f32.mrb[28].mxu0 }
 0x386   : > { %v1204_v37 = vadd.f32 %v1203_v31, %v3406_v30  ;;  %v1365_v43 = vadd.f32 %v1364_v32, %v3411_v41  ;;  %v1205_v6 = vpop.f32.mrb[13].mxu1  ;;  %v1366_v44 = vpop.f32.mrb[29].mxu0 }
 0x387   : > { %v1206_v34 = vadd.f32 %v1205_v6, %v3417_v63  ;;  %v1367_v47 = vadd.f32 %v1366_v44, %v3420_v4 }
 0x388   : > { %v1793_v48 = vmax.f32 %v1204_v37, 0.0  ;;  %v1795_v52 = vmax.f32 %v1365_v43, 0.0 }
 0x389   : > { %v1794_v55 = vmax.f32 %v1206_v34, 0.0  ;;  %v1796_v57 = vmax.f32 %v1367_v47, 0.0  ;;  %v1209_v58 = vpop.f32.mrb[14].mxu1  ;;  %v1370_v59 = vpop.f32.mrb[30].mxu0 }
 0x38a   : > { %v1879_v60 = vmax.f32 %v1878_v25, %v1793_v48  ;;  %v1921_v62 = vmax.f32 %v1920_v27, %v1795_v52  ;;  %v1210_v0 = vadd.f32 %v1209_v58, %v3406_v30  ;;  %v1371_v1 = vadd.f32 %v1370_v59, %v3411_v41  ;;  %v1211_v5 = vpop.f32.mrb[15].mxu1  ;;  %v1372_v7 = vpop.f32.mrb[31].mxu0 }
 0x38b   : > { %v1900_v9 = vmax.f32 %v1899_v28, %v1794_v55  ;;  %v1942_v53 = vmax.f32 %v1941_v2, %v1796_v57  ;;  %v1212_v26 = vadd.f32 %v1211_v5, %v3417_v63  ;;  %v1373_v51 = vadd.f32 %v1372_v7, %v3420_v4 }
 0x38c   : > { %v1801_v54 = vmax.f32 %v1210_v0, 0.0  ;;  %v1803_v18 = vmax.f32 %v1371_v1, 0.0 }
 0x38d   : > { %v1802_v36 = vmax.f32 %v1212_v26, 0.0  ;;  %v1804_v40 = vmax.f32 %v1373_v51, 0.0 }
 0x38e   : > { %v1880_v38 = vmax.f32 %v1879_v60, %v1801_v54  ;;  %v1922_v35 = vmax.f32 %v1921_v62, %v1803_v18 }
 0x38f   : > { %v1901_v24 = vmax.f32 %v1900_v9, %v1802_v36  ;;  %v1943_v29 = vmax.f32 %v1942_v53, %v1804_v40 }
 0x39e   : > { %v1215_v42 = vpop.f32.mrb[16].mxu1  ;;  %v1376_v46 = vpop.f32.mrb[32].mxu0 }
 0x39f   : > { %v1216_v50 = vadd.f32 %v1215_v42, %v3406_v30  ;;  %v1377_v10 = vadd.f32 %v1376_v46, %v3411_v41  ;;  %v1217_v56 = vpop.f32.mrb[17].mxu1  ;;  %v1378_v61 = vpop.f32.mrb[33].mxu0 }
 0x3a0   : > { %v1218_v8 = vadd.f32 %v1217_v56, %v3417_v63  ;;  %v1379_v11 = vadd.f32 %v1378_v61, %v3420_v4 }
 0x3a1   : > { %v1809_v12 = vmax.f32 %v1216_v50, 0.0  ;;  %v1811_v13 = vmax.f32 %v1377_v10, 0.0 }
 0x3a2   : > { %v1810_v14 = vmax.f32 %v1218_v8, 0.0  ;;  %v1812_v15 = vmax.f32 %v1379_v11, 0.0  ;;  %v1221_v16 = vpop.f32.mrb[18].mxu1  ;;  %v1382_v17 = vpop.f32.mrb[34].mxu0 }
 0x3a3   : > { %v1881_v19 = vmax.f32 %v1880_v38, %v1809_v12  ;;  %v1923_v20 = vmax.f32 %v1922_v35, %v1811_v13  ;;  %v1222_v49 = vadd.f32 %v1221_v16, %v3406_v30  ;;  %v1383_v21 = vadd.f32 %v1382_v17, %v3411_v41  ;;  %v1223_v45 = vpop.f32.mrb[19].mxu1  ;;  %v1384_v22 = vpop.f32.mrb[35].mxu0 }
 0x3a4   : > { %v1902_v23 = vmax.f32 %v1901_v24, %v1810_v14  ;;  %v1944_v3 = vmax.f32 %v1943_v29, %v1812_v15  ;;  %v1224_v25 = vadd.f32 %v1223_v45, %v3417_v63  ;;  %v1385_v27 = vadd.f32 %v1384_v22, %v3420_v4 }
 0x3a5   : > { %v1817_v28 = vmax.f32 %v1222_v49, 0.0  ;;  %v1819_v2 = vmax.f32 %v1383_v21, 0.0 }
 0x3a6   : > { %v1818_v31 = vmax.f32 %v1224_v25, 0.0  ;;  %v1820_v32 = vmax.f32 %v1385_v27, 0.0 }
 0x3a7   : > { %v1882_v37 = vmax.f32 %v1881_v19, %v1817_v28  ;;  %v1924_v43 = vmax.f32 %v1923_v20, %v1819_v2 }
 0x3a8   : > { %v1903_v6 = vmax.f32 %v1902_v23, %v1818_v31  ;;  %v1945_v44 = vmax.f32 %v1944_v3, %v1820_v32 }
 0x3b1   : > { %v1227_v34 = vpop.f32.mrb[20].mxu1  ;;  %v1388_v47 = vpop.f32.mrb[36].mxu0 }
 0x3b2   : > { %v1228_v48 = vadd.f32 %v1227_v34, %v3406_v30  ;;  %v1389_v52 = vadd.f32 %v1388_v47, %v3411_v41  ;;  %v1229_v55 = vpop.f32.mrb[21].mxu1  ;;  %v1390_v57 = vpop.f32.mrb[37].mxu0 }
 0x3b3   : > { %v1230_v58 = vadd.f32 %v1229_v55, %v3417_v63  ;;  %v1391_v59 = vadd.f32 %v1390_v57, %v3420_v4 }
 0x3b4   : > { %v1825_v60 = vmax.f32 %v1228_v48, 0.0  ;;  %v1827_v62 = vmax.f32 %v1389_v52, 0.0 }
 0x3b5   : > { %v1826_v0 = vmax.f32 %v1230_v58, 0.0  ;;  %v1828_v1 = vmax.f32 %v1391_v59, 0.0  ;;  %v1233_v5 = vpop.f32.mrb[22].mxu1  ;;  %v1394_v7 = vpop.f32.mrb[38].mxu0  ;;  %v1079_v58 = vsub.s32 4, %v3051_v33  ;;  %v1087_v59 = vsub.s32 6, %v3051_v33 }
 0x3b6   : > { %v1883_v9 = vmax.f32 %v1882_v37, %v1825_v60  ;;  %v1925_v53 = vmax.f32 %v1924_v43, %v1827_v62  ;;  %v1234_v26 = vadd.f32 %v1233_v5, %v3406_v30  ;;  %v1395_v51 = vadd.f32 %v1394_v7, %v3411_v41  ;;  %v1235_v54 = vpop.f32.mrb[23].mxu1  ;;  %v1396_v18 = vpop.f32.mrb[39].mxu0 }
 0x3b7   : > { %v1904_v36 = vmax.f32 %v1903_v6, %v1826_v0  ;;  %v1946_v40 = vmax.f32 %v1945_v44, %v1828_v1  ;;  %v1236_v38 = vadd.f32 %v1235_v54, %v3417_v63  ;;  %v1397_v35 = vadd.f32 %v1396_v18, %v3420_v4 }
 0x3b8   : > { %v1833_v24 = vmax.f32 %v1234_v26, 0.0  ;;  %v1835_v29 = vmax.f32 %v1395_v51, 0.0  ;;  %v1083_v60 = vsub.s32 5, %v3051_v33  ;;  %v2787_v1 = vmov 1966171168  }
 0x3b9   : > { %v1834_v42 = vmax.f32 %v1236_v38, 0.0  ;;  %v1836_v46 = vmax.f32 %v1397_v35, 0.0  ;;  %v2055_v5 = vunpack.c.l.s4 %v2787_v1  ;;  %v1091_v7 = vsub.s32 7, %v3051_v33 }
 0x3ba   : > { %v1884_v50 = vmax.f32 %v1883_v9, %v1833_v24  ;;  %v1926_v10 = vmax.f32 %v1925_v53, %v1835_v29  ;;  %v3520_v35 = vrot.slane %v3395_v39, %v1087_v59  ;;  %v3523_v24 = vrot.slane %v3395_v39, %v1083_v60 }
 0x3bb   : > { %v1905_v56 = vmax.f32 %v1904_v36, %v1834_v42  ;;  %v1947_v61 = vmax.f32 %v1946_v40, %v1836_v46  ;;  %v3517_v36 = vrot.slane %v3395_v39, %v1079_v58 }
 0x3c4   : > { %v1239_v8 = vpop.f32.mrb[24].mxu1  ;;  %v1400_v11 = vpop.f32.mrb[40].mxu0 }
 0x3c5   : > { %v1240_v12 = vadd.f32 %v1239_v8, %v3406_v30  ;;  %v1401_v13 = vadd.f32 %v1400_v11, %v3411_v41  ;;  %v1241_v14 = vpop.f32.mrb[25].mxu1  ;;  %v1402_v15 = vpop.f32.mrb[41].mxu0 }
 0x3c6   : > { %v1242_v16 = vadd.f32 %v1241_v14, %v3417_v63  ;;  %v1403_v17 = vadd.f32 %v1402_v15, %v3420_v4 }
 0x3c7   : > { %v1841_v19 = vmax.f32 %v1240_v12, 0.0  ;;  %v1843_v20 = vmax.f32 %v1401_v13, 0.0 }
 0x3c8   : > { %v1842_v49 = vmax.f32 %v1242_v16, 0.0  ;;  %v1844_v21 = vmax.f32 %v1403_v17, 0.0  ;;  %v1245_v45 = vpop.f32.mrb[26].mxu1  ;;  %v1406_v22 = vpop.f32.mrb[42].mxu0 }
 0x3c9   : > { %v1885_v23 = vmax.f32 %v1884_v50, %v1841_v19  ;;  %v1927_v3 = vmax.f32 %v1926_v10, %v1843_v20  ;;  %v1246_v25 = vadd.f32 %v1245_v45, %v3406_v30  ;;  %v1407_v27 = vadd.f32 %v1406_v22, %v3411_v41  ;;  %v1247_v28 = vpop.f32.mrb[27].mxu1  ;;  %v1408_v2 = vpop.f32.mrb[43].mxu0 }
 0x3ca   : > { %v1906_v31 = vmax.f32 %v1905_v56, %v1842_v49  ;;  %v1948_v32 = vmax.f32 %v1947_v61, %v1844_v21  ;;  %v1248_v37 = vadd.f32 %v1247_v28, %v3417_v63  ;;  %v1409_v43 = vadd.f32 %v1408_v2, %v3420_v4 }
 0x3cb   : > { %v1849_v6 = vmax.f32 %v1246_v25, 0.0  ;;  %v1851_v44 = vmax.f32 %v1407_v27, 0.0  ;;  %v2056_v10 = vunpack.c.0.s8 %v2055_v5  ;;  %v3526_v56 = vrot.slane %v3395_v39, %v1091_v7 }
 0x3cc   : > { %v1850_v34 = vmax.f32 %v1248_v37, 0.0  ;;  %v1852_v47 = vmax.f32 %v1409_v43, 0.0 }
 0x3cd   : > { %v1886_v48 = vmax.f32 %v1885_v23, %v1849_v6  ;;  %v1928_v52 = vmax.f32 %v1927_v3, %v1851_v44  ;;  %v3533_v39 = vsub.s32 %v2056_v10, %v3051_v33 }
 0x3ce   : > { %v1907_v55 = vmax.f32 %v1906_v31, %v1850_v34  ;;  %v1949_v57 = vmax.f32 %v1948_v32, %v1852_v47 }
 0x3d7   : > { %v1251_v62 = vpop.f32.mrb[28].mxu1  ;;  %v1412_v0 = vpop.f32.mrb[44].mxu0 }
 0x3d8   : > { %v1252_v9 = vadd.f32 %v1251_v62, %v3406_v30  ;;  %v1413_v53 = vadd.f32 %v1412_v0, %v3411_v41  ;;  %v1253_v26 = vpop.f32.mrb[29].mxu1  ;;  %v1414_v51 = vpop.f32.mrb[45].mxu0 }
 0x3d9   : > { %v1254_v54 = vadd.f32 %v1253_v26, %v3417_v63  ;;  %v1415_v18 = vadd.f32 %v1414_v51, %v3420_v4 }
 0x3da   : > { %v1857_v40 = vmax.f32 %v1252_v9, 0.0  ;;  %v1859_v38 = vmax.f32 %v1413_v53, 0.0 }
 0x3db   : > { %v1858_v29 = vmax.f32 %v1254_v54, 0.0  ;;  %v1860_v42 = vmax.f32 %v1415_v18, 0.0  ;;  %v1257_v46 = vpop.f32.mrb[30].mxu1  ;;  %v1418_v50 = vpop.f32.mrb[46].mxu0 }
 0x3dc   : > { %v1887_v61 = vmax.f32 %v1886_v48, %v1857_v40  ;;  %v1929_v8 = vmax.f32 %v1928_v52, %v1859_v38  ;;  %v1258_v11 = vadd.f32 %v1257_v46, %v3406_v30  ;;  %v1419_v12 = vadd.f32 %v1418_v50, %v3411_v41  ;;  %v1259_v13 = vpop.f32.mrb[31].mxu1  ;;  %v1420_v14 = vpop.f32.mrb[47].mxu0 }
 0x3dd   : > { %v1908_v15 = vmax.f32 %v1907_v55, %v1858_v29  ;;  %v1950_v16 = vmax.f32 %v1949_v57, %v1860_v42  ;;  %v1260_v17 = vadd.f32 %v1259_v13, %v3417_v63  ;;  %v1421_v19 = vadd.f32 %v1420_v14, %v3420_v4 }
 0x3de   : > { %v1865_v20 = vmax.f32 %v1258_v11, 0.0  ;;  %v1867_v49 = vmax.f32 %v1419_v12, 0.0 }
 0x3df   : > { %v1866_v21 = vmax.f32 %v1260_v17, 0.0  ;;  %v1868_v45 = vmax.f32 %v1421_v19, 0.0  ;;  %v1489_v22 = vpop.f32.mrb[32].mxu1  ;;  %v1650_v23 = vpop.f32.mrb[48].mxu0 }
 0x3e0   : > { %v1888_v30 = vmax.f32 %v1887_v61, %v1865_v20  ;;  %v1930_v3 = vmax.f32 %v1929_v8, %v1867_v49  ;;  %v1490_v41 = vadd.f32 %v1489_v22, %v3517_v36  ;;  %v1651_v25 = vadd.f32 %v1650_v23, %v3520_v35  ;;  %v1491_v27 = vpop.f32.mrb[33].mxu1  ;;  %v1652_v28 = vpop.f32.mrb[49].mxu0 }
 0x3e1   : > { %v1909_v63 = vmax.f32 %v1908_v15, %v1866_v21  ;;  %v1951_v2 = vmax.f32 %v1950_v16, %v1868_v45  ;;  %v1492_v4 = vadd.f32 %v1491_v27, %v3523_v24  ;;  %v1653_v31 = vadd.f32 %v1652_v28, %v3526_v56 }
 0x3e2   : > { %v1889_v32 = vrot.slane %v1888_v30, 4  ;;  %v1931_v33 = vrot.slane %v1930_v3, 4  ;;  %v1749_v37 = vmax.f32 %v1490_v41, 0.0  ;;  %v1751_v43 = vmax.f32 %v1651_v25, 0.0 }
 0x3e3   : > { %v1910_v6 = vrot.slane %v1909_v63, 4  ;;  %v1952_v44 = vrot.slane %v1951_v2, 4  ;;  %v1750_v34 = vmax.f32 %v1492_v4, 0.0  ;;  %v1752_v47 = vmax.f32 %v1653_v31, 0.0  ;;  %v1495_v48 = vpop.f32.mrb[34].mxu1  ;;  %v1656_v52 = vpop.f32.mrb[50].mxu0 }
 0x3e4   : > { %v1890_v55 = vmax.f32 %v1888_v30, %v1889_v32  ;;  %v1932_v57 = vmax.f32 %v1930_v3, %v1931_v33  ;;  %v1496_v58 = vadd.f32 %v1495_v48, %v3517_v36  ;;  %v1657_v59 = vadd.f32 %v1656_v52, %v3520_v35  ;;  %v1497_v60 = vpop.f32.mrb[35].mxu1  ;;  %v1658_v62 = vpop.f32.mrb[51].mxu0 }
 0x3e5   : > { %v1911_v0 = vmax.f32 %v1909_v63, %v1910_v6  ;;  %v1953_v1 = vmax.f32 %v1951_v2, %v1952_v44  ;;  %v1498_v5 = vadd.f32 %v1497_v60, %v3523_v24  ;;  %v1659_v7 = vadd.f32 %v1658_v62, %v3526_v56 }
 0x3e6   : > { %v1891_v9 = vrot.slane %v1890_v55, 2  ;;  %v1933_v53 = vrot.slane %v1932_v57, 2  ;;  %v1757_v26 = vmax.f32 %v1496_v58, 0.0  ;;  %v1759_v51 = vmax.f32 %v1657_v59, 0.0 }
 0x3e7   : > { %v1912_v54 = vrot.slane %v1911_v0, 2  ;;  %v1954_v18 = vrot.slane %v1953_v1, 2  ;;  %v1758_v40 = vmax.f32 %v1498_v5, 0.0  ;;  %v1760_v38 = vmax.f32 %v1659_v7, 0.0  ;;  %v1501_v29 = vpop.f32.mrb[36].mxu1  ;;  %v1662_v42 = vpop.f32.mrb[52].mxu0 }
 0x3e8   : > { %v1892_v46 = vmax.f32 %v1890_v55, %v1891_v9  ;;  %v1934_v50 = vmax.f32 %v1932_v57, %v1933_v53  ;;  %v1958_v10 = vmax.f32 %v1749_v37, %v1757_v26  ;;  %v2000_v61 = vmax.f32 %v1751_v43, %v1759_v51  ;;  %v1503_v8 = vpop.f32.mrb[37].mxu1  ;;  %v1664_v11 = vpop.f32.mrb[53].mxu0 }
 0x3e9   : > { %v1913_v12 = vmax.f32 %v1911_v0, %v1912_v54  ;;  %v1955_v13 = vmax.f32 %v1953_v1, %v1954_v18  ;;  %v1979_v14 = vmax.f32 %v1750_v34, %v1758_v40  ;;  %v2021_v15 = vmax.f32 %v1752_v47, %v1760_v38 }
 0x3ea   : > { %v1893_v16 = vrot.slane %v1892_v46, 1  ;;  %v1935_v17 = vrot.slane %v1934_v50, 1  ;;  %v1502_v19 = vadd.f32 %v1501_v29, %v3517_v36  ;;  %v1663_v20 = vadd.f32 %v1662_v42, %v3520_v35 }
 0x3eb   : > { %v1914_v49 = vrot.slane %v1913_v12, 1  ;;  %v1956_v21 = vrot.slane %v1955_v13, 1  ;;  %v1504_v45 = vadd.f32 %v1503_v8, %v3523_v24  ;;  %v1665_v22 = vadd.f32 %v1664_v11, %v3526_v56  ;;  %v1507_v23 = vpop.f32.mrb[38].mxu1  ;;  %v1668_v30 = vpop.f32.mrb[54].mxu0 }
 0x3ec   : > { %v1894_v3 = vmax.f32 %v1892_v46, %v1893_v16  ;;  %v1936_v41 = vmax.f32 %v1934_v50, %v1935_v17  ;;  %v1765_v25 = vmax.f32 %v1502_v19, 0.0  ;;  %v1767_v27 = vmax.f32 %v1663_v20, 0.0  ;;  %v1509_v28 = vpop.f32.mrb[39].mxu1  ;;  %v1670_v63 = vpop.f32.mrb[55].mxu0 }
 0x3ed   : > { %v1915_v2 = vmax.f32 %v1913_v12, %v1914_v49  ;;  %v1957_v4 = vmax.f32 %v1955_v13, %v1956_v21  ;;  %v1766_v31 = vmax.f32 %v1504_v45, 0.0  ;;  %v1768_v32 = vmax.f32 %v1665_v22, 0.0 }
 0x3ee   : > { %v1959_v33 = vmax.f32 %v1958_v10, %v1765_v25  ;;  %v2001_v37 = vmax.f32 %v2000_v61, %v1767_v27  ;;  %v1508_v43 = vadd.f32 %v1507_v23, %v3517_v36  ;;  %v1669_v6 = vadd.f32 %v1668_v30, %v3520_v35 }
 0x3ef   : > { %v2050_v44 = vcombine.low %v1894_v3, %v1915_v2  ;;  %v2051_v34 = vcombine.low %v1936_v41, %v1957_v4  ;;  %v1980_v47 = vmax.f32 %v1979_v14, %v1766_v31  ;;  %v2022_v48 = vmax.f32 %v2021_v15, %v1768_v32  ;;  %v1513_v52 = vpop.f32.mrb[40].mxu1  ;;  %v1674_v55 = vpop.f32.mrb[56].mxu0 }
 0x3f0   : > { %v1773_v57 = vmax.f32 %v1508_v43, 0.0  ;;  %v1775_v58 = vmax.f32 %v1669_v6, 0.0  ;;  %v1510_v59 = vadd.f32 %v1509_v28, %v3523_v24  ;;  %v1671_v60 = vadd.f32 %v1670_v63, %v3526_v56  ;;  %v1515_v62 = vpop.f32.mrb[41].mxu1  ;;  %v1676_v0 = vpop.f32.mrb[57].mxu0 }
 0x3f1   : > { %v3552_v1 = vrot.slane %v2050_v44, %v3533_v39  ;;  %v3555_v5 = vrot.slane %v2051_v34, %v3533_v39  ;;  %v1514_v7 = vadd.f32 %v1513_v52, %v3517_v36  ;;  %v1675_v9 = vadd.f32 %v1674_v55, %v3520_v35 }
 0x3f2   : > { %v1960_v53 = vmax.f32 %v1959_v33, %v1773_v57  ;;  %v2002_v26 = vmax.f32 %v2001_v37, %v1775_v58  ;;  %v1774_v51 = vmax.f32 %v1510_v59, 0.0  ;;  %v1776_v54 = vmax.f32 %v1671_v60, 0.0 }
 0x3f3   : > { %v1781_v18 = vmax.f32 %v1514_v7, 0.0  ;;  %v1783_v40 = vmax.f32 %v1675_v9, 0.0  ;;  %v1516_v38 = vadd.f32 %v1515_v62, %v3523_v24  ;;  %v1677_v29 = vadd.f32 %v1676_v0, %v3526_v56  ;;  %v1519_v42 = vpop.f32.mrb[42].mxu1  ;;  %v1680_v46 = vpop.f32.mrb[58].mxu0 }
 0x3f4   : > { %v1981_v50 = vmax.f32 %v1980_v47, %v1774_v51  ;;  %v2023_v10 = vmax.f32 %v2022_v48, %v1776_v54  ;;  %v1520_v61 = vadd.f32 %v1519_v42, %v3517_v36  ;;  %v1681_v8 = vadd.f32 %v1680_v46, %v3520_v35  ;;  %v1521_v11 = vpop.f32.mrb[43].mxu1  ;;  %v1682_v12 = vpop.f32.mrb[59].mxu0 }
 0x3f5   : > { %v1961_v13 = vmax.f32 %v1960_v53, %v1781_v18  ;;  %v2003_v14 = vmax.f32 %v2002_v26, %v1783_v40  ;;  %v1782_v15 = vmax.f32 %v1516_v38, 0.0  ;;  %v1784_v16 = vmax.f32 %v1677_v29, 0.0 }
 0x3f6   : > { %v1789_v17 = vmax.f32 %v1520_v61, 0.0  ;;  %v1791_v19 = vmax.f32 %v1681_v8, 0.0  ;;  %v1522_v20 = vadd.f32 %v1521_v11, %v3523_v24  ;;  %v1683_v49 = vadd.f32 %v1682_v12, %v3526_v56 }
 0x3f7   : > { %v1982_v21 = vmax.f32 %v1981_v50, %v1782_v15  ;;  %v2024_v45 = vmax.f32 %v2023_v10, %v1784_v16  ;;  %v1525_v22 = vpop.f32.mrb[44].mxu1  ;;  %v1686_v23 = vpop.f32.mrb[60].mxu0  ;;  %v2082_v30 = vcombine.low %v3552_v1, %v3555_v5 }
 0x3f8   : > { %v1962_v3 = vmax.f32 %v1961_v13, %v1789_v17  ;;  %v2004_v41 = vmax.f32 %v2003_v14, %v1791_v19  ;;  %v1790_v25 = vmax.f32 %v1522_v20, 0.0  ;;  %v1792_v27 = vmax.f32 %v1683_v49, 0.0  ;;  %v1527_v28 = vpop.f32.mrb[45].mxu1  ;;  %v1688_v63 = vpop.f32.mrb[61].mxu0 }
 0x3f9   : > { %v1526_v2 = vadd.f32 %v1525_v22, %v3517_v36  ;;  %v1687_v4 = vadd.f32 %v1686_v23, %v3520_v35  ;;  %v1528_v31 = vadd.f32 %v1527_v28, %v3523_v24  ;;  %v1689_v32 = vadd.f32 %v1688_v63, %v3526_v56 }
 0x3fa   : > { %v1983_v33 = vmax.f32 %v1982_v21, %v1790_v25  ;;  %v2025_v37 = vmax.f32 %v2024_v45, %v1792_v27 }
 0x3fb   : > { %v1797_v43 = vmax.f32 %v1526_v2, 0.0  ;;  %v1799_v6 = vmax.f32 %v1687_v4, 0.0  ;;  %v1798_v44 = vmax.f32 %v1528_v31, 0.0  ;;  %v1800_v34 = vmax.f32 %v1689_v32, 0.0  ;;  %v1531_v47 = vpop.f32.mrb[46].mxu1  ;;  %v1692_v48 = vpop.f32.mrb[62].mxu0 }
 0x3fc   : > { %v1532_v52 = vadd.f32 %v1531_v47, %v3517_v36  ;;  %v1693_v55 = vadd.f32 %v1692_v48, %v3520_v35  ;;  %v1533_v57 = vpop.f32.mrb[47].mxu1  ;;  %v1694_v58 = vpop.f32.mrb[63].mxu0 }
 0x3fd   : > { %v1963_v59 = vmax.f32 %v1962_v3, %v1797_v43  ;;  %v2005_v60 = vmax.f32 %v2004_v41, %v1799_v6  ;;  %v1984_v62 = vmax.f32 %v1983_v33, %v1798_v44  ;;  %v2026_v0 = vmax.f32 %v2025_v37, %v1800_v34 }
 0x3fe   : > { %v1805_v7 = vmax.f32 %v1532_v52, 0.0  ;;  %v1807_v9 = vmax.f32 %v1693_v55, 0.0  ;;  %v1534_v53 = vadd.f32 %v1533_v57, %v3523_v24  ;;  %v1695_v26 = vadd.f32 %v1694_v58, %v3526_v56 }
 0x3ff   : > { %v1537_v51 = vpop.f32.mrb[48].mxu1  ;;  %v1698_v54 = vpop.f32.mrb[64].mxu0 }
 0x400   : > { %v1964_v18 = vmax.f32 %v1963_v59, %v1805_v7  ;;  %v2006_v40 = vmax.f32 %v2005_v60, %v1807_v9  ;;  %v1806_v38 = vmax.f32 %v1534_v53, 0.0  ;;  %v1808_v29 = vmax.f32 %v1695_v26, 0.0  ;;  %v1539_v42 = vpop.f32.mrb[49].mxu1  ;;  %v1700_v46 = vpop.f32.mrb[65].mxu0 }
 0x401   : > { %v1538_v50 = vadd.f32 %v1537_v51, %v3517_v36  ;;  %v1699_v10 = vadd.f32 %v1698_v54, %v3520_v35  ;;  %v1540_v61 = vadd.f32 %v1539_v42, %v3523_v24  ;;  %v1701_v8 = vadd.f32 %v1700_v46, %v3526_v56 }
 0x402   : > { %v1985_v11 = vmax.f32 %v1984_v62, %v1806_v38  ;;  %v2027_v12 = vmax.f32 %v2026_v0, %v1808_v29 }
 0x403   : > { %v1813_v13 = vmax.f32 %v1538_v50, 0.0  ;;  %v1815_v14 = vmax.f32 %v1699_v10, 0.0  ;;  %v1814_v15 = vmax.f32 %v1540_v61, 0.0  ;;  %v1816_v16 = vmax.f32 %v1701_v8, 0.0  ;;  %v1543_v17 = vpop.f32.mrb[50].mxu1  ;;  %v1704_v19 = vpop.f32.mrb[66].mxu0 }
 0x404   : > { %v1544_v20 = vadd.f32 %v1543_v17, %v3517_v36  ;;  %v1705_v49 = vadd.f32 %v1704_v19, %v3520_v35  ;;  %v1545_v21 = vpop.f32.mrb[51].mxu1  ;;  %v1706_v45 = vpop.f32.mrb[67].mxu0 }
 0x405   : > { %v1965_v22 = vmax.f32 %v1964_v18, %v1813_v13  ;;  %v2007_v23 = vmax.f32 %v2006_v40, %v1815_v14  ;;  %v1986_v3 = vmax.f32 %v1985_v11, %v1814_v15  ;;  %v2028_v41 = vmax.f32 %v2027_v12, %v1816_v16 }
 0x406   : > { %v1821_v25 = vmax.f32 %v1544_v20, 0.0  ;;  %v1823_v27 = vmax.f32 %v1705_v49, 0.0  ;;  %v1546_v28 = vadd.f32 %v1545_v21, %v3523_v24  ;;  %v1707_v63 = vadd.f32 %v1706_v45, %v3526_v56 }
 0x407   : > { %v1549_v2 = vpop.f32.mrb[52].mxu1  ;;  %v1710_v4 = vpop.f32.mrb[68].mxu0 }
 0x408   : > { %v1966_v31 = vmax.f32 %v1965_v22, %v1821_v25  ;;  %v2008_v32 = vmax.f32 %v2007_v23, %v1823_v27  ;;  %v1822_v33 = vmax.f32 %v1546_v28, 0.0  ;;  %v1824_v37 = vmax.f32 %v1707_v63, 0.0  ;;  %v1551_v43 = vpop.f32.mrb[53].mxu1  ;;  %v1712_v6 = vpop.f32.mrb[69].mxu0 }
 0x409   : > { %v1550_v44 = vadd.f32 %v1549_v2, %v3517_v36  ;;  %v1711_v34 = vadd.f32 %v1710_v4, %v3520_v35  ;;  %v1552_v47 = vadd.f32 %v1551_v43, %v3523_v24  ;;  %v1713_v48 = vadd.f32 %v1712_v6, %v3526_v56 }
 0x40a   : > { %v1987_v52 = vmax.f32 %v1986_v3, %v1822_v33  ;;  %v2029_v55 = vmax.f32 %v2028_v41, %v1824_v37 }
 0x40b   : > { %v1829_v57 = vmax.f32 %v1550_v44, 0.0  ;;  %v1831_v58 = vmax.f32 %v1711_v34, 0.0  ;;  %v1830_v59 = vmax.f32 %v1552_v47, 0.0  ;;  %v1832_v60 = vmax.f32 %v1713_v48, 0.0  ;;  %v1555_v62 = vpop.f32.mrb[54].mxu1  ;;  %v1716_v0 = vpop.f32.mrb[70].mxu0 }
 0x40c   : > { %v1556_v7 = vadd.f32 %v1555_v62, %v3517_v36  ;;  %v1717_v9 = vadd.f32 %v1716_v0, %v3520_v35  ;;  %v1557_v53 = vpop.f32.mrb[55].mxu1  ;;  %v1718_v26 = vpop.f32.mrb[71].mxu0 }
 0x40d   : > { %v1967_v51 = vmax.f32 %v1966_v31, %v1829_v57  ;;  %v2009_v54 = vmax.f32 %v2008_v32, %v1831_v58  ;;  %v1988_v18 = vmax.f32 %v1987_v52, %v1830_v59  ;;  %v2030_v40 = vmax.f32 %v2029_v55, %v1832_v60 }
 0x40e   : > { %v1837_v38 = vmax.f32 %v1556_v7, 0.0  ;;  %v1839_v29 = vmax.f32 %v1717_v9, 0.0  ;;  %v1558_v42 = vadd.f32 %v1557_v53, %v3523_v24  ;;  %v1719_v46 = vadd.f32 %v1718_v26, %v3526_v56 }
 0x40f   : > { %v1561_v50 = vpop.f32.mrb[56].mxu1  ;;  %v1722_v10 = vpop.f32.mrb[72].mxu0 }
 0x410   : > { %v1968_v61 = vmax.f32 %v1967_v51, %v1837_v38  ;;  %v2010_v8 = vmax.f32 %v2009_v54, %v1839_v29  ;;  %v1838_v11 = vmax.f32 %v1558_v42, 0.0  ;;  %v1840_v12 = vmax.f32 %v1719_v46, 0.0  ;;  %v1563_v13 = vpop.f32.mrb[57].mxu1  ;;  %v1724_v14 = vpop.f32.mrb[73].mxu0 }
 0x411   : > { %v1562_v15 = vadd.f32 %v1561_v50, %v3517_v36  ;;  %v1723_v16 = vadd.f32 %v1722_v10, %v3520_v35  ;;  %v1564_v17 = vadd.f32 %v1563_v13, %v3523_v24  ;;  %v1725_v19 = vadd.f32 %v1724_v14, %v3526_v56 }
 0x412   : > { %v1989_v20 = vmax.f32 %v1988_v18, %v1838_v11  ;;  %v2031_v49 = vmax.f32 %v2030_v40, %v1840_v12 }
 0x413   : > { %v1845_v21 = vmax.f32 %v1562_v15, 0.0  ;;  %v1847_v45 = vmax.f32 %v1723_v16, 0.0  ;;  %v1846_v22 = vmax.f32 %v1564_v17, 0.0  ;;  %v1848_v23 = vmax.f32 %v1725_v19, 0.0  ;;  %v1567_v3 = vpop.f32.mrb[58].mxu1  ;;  %v1728_v41 = vpop.f32.mrb[74].mxu0 }
 0x414   : > { %v1568_v25 = vadd.f32 %v1567_v3, %v3517_v36  ;;  %v1729_v27 = vadd.f32 %v1728_v41, %v3520_v35  ;;  %v1569_v28 = vpop.f32.mrb[59].mxu1  ;;  %v1730_v63 = vpop.f32.mrb[75].mxu0 }
 0x415   : > { %v1969_v2 = vmax.f32 %v1968_v61, %v1845_v21  ;;  %v2011_v4 = vmax.f32 %v2010_v8, %v1847_v45  ;;  %v1990_v31 = vmax.f32 %v1989_v20, %v1846_v22  ;;  %v2032_v32 = vmax.f32 %v2031_v49, %v1848_v23 }
 0x416   : > { %v1853_v33 = vmax.f32 %v1568_v25, 0.0  ;;  %v1855_v37 = vmax.f32 %v1729_v27, 0.0  ;;  %v1570_v43 = vadd.f32 %v1569_v28, %v3523_v24  ;;  %v1731_v6 = vadd.f32 %v1730_v63, %v3526_v56 }
 0x417   : > { %v1573_v44 = vpop.f32.mrb[60].mxu1 }
 0x418   : > { %v1970_v34 = vmax.f32 %v1969_v2, %v1853_v33  ;;  %v2012_v47 = vmax.f32 %v2011_v4, %v1855_v37  ;;  %v1854_v48 = vmax.f32 %v1570_v43, 0.0  ;;  %v1856_v52 = vmax.f32 %v1731_v6, 0.0  ;;  %v1575_v55 = vpop.f32.mrb[61].mxu1 }
 0x419   : > { %v1574_v57 = vadd.f32 %v1573_v44, %v3517_v36  ;;  %v1576_v58 = vadd.f32 %v1575_v55, %v3523_v24 }
 0x41a   : > { %v1991_v59 = vmax.f32 %v1990_v31, %v1854_v48  ;;  %v2033_v60 = vmax.f32 %v2032_v32, %v1856_v52 }
 0x41b   : > { %v1861_v62 = vmax.f32 %v1574_v57, 0.0  ;;  %v1862_v0 = vmax.f32 %v1576_v58, 0.0  ;;  %v1579_v7 = vpop.f32.mrb[62].mxu1  ;;  %v2090_v58 = vrot.slane %v2082_v30, %v3533_v39 }
 0x41c   : > { %v1580_v9 = vadd.f32 %v1579_v7, %v3517_v36  ;;  %v1581_v53 = vpop.f32.mrb[63].mxu1 }
 0x41d   : > { %v1971_v26 = vmax.f32 %v1970_v34, %v1861_v62  ;;  %v1992_v51 = vmax.f32 %v1991_v59, %v1862_v0  ;;  %v1582_v54 = vadd.f32 %v1581_v53, %v3523_v24 }
 0x41e   : > { %v1869_v18 = vmax.f32 %v1580_v9, 0.0 }
 0x41f   : > { %v1870_v40 = vmax.f32 %v1582_v54, 0.0  ;;  %v1734_v38 = vpop.f32.mrb[64].mxu1 }
 0x420   : > { %v1972_v29 = vmax.f32 %v1971_v26, %v1869_v18  ;;  %v1735_v42 = vadd.f32 %v1734_v38, %v3520_v35  ;;  %v1736_v46 = vpop.f32.mrb[65].mxu1 }
 0x421   : > { %v1993_v50 = vmax.f32 %v1992_v51, %v1870_v40  ;;  %v1737_v10 = vadd.f32 %v1736_v46, %v3526_v56 }
 0x422   : > { %v1973_v61 = vrot.slane %v1972_v29, 4  ;;  %v1863_v8 = vmax.f32 %v1735_v42, 0.0 }
 0x423   : > { %v1994_v11 = vrot.slane %v1993_v50, 4  ;;  %v1864_v12 = vmax.f32 %v1737_v10, 0.0  ;;  %v1740_v36 = vpop.f32.mrb[66].mxu1 }
 0x424   : > { %v1974_v13 = vmax.f32 %v1972_v29, %v1973_v61  ;;  %v2013_v14 = vmax.f32 %v2012_v47, %v1863_v8  ;;  %v1741_v15 = vadd.f32 %v1740_v36, %v3520_v35  ;;  %v1742_v24 = vpop.f32.mrb[67].mxu1 }
 0x425   : > { %v1995_v16 = vmax.f32 %v1993_v50, %v1994_v11  ;;  %v2034_v17 = vmax.f32 %v2033_v60, %v1864_v12  ;;  %v1743_v19 = vadd.f32 %v1742_v24, %v3526_v56  ;;  %v1873_v60 = vld [vmem:[%s2976_s30] sm:$0xff] }
 0x426   : > { %v1975_v20 = vrot.slane %v1974_v13, 2  ;;  %v1871_v49 = vmax.f32 %v1741_v15, 0.0 }
 0x427   : > { %v1996_v21 = vrot.slane %v1995_v16, 2  ;;  %v1872_v45 = vmax.f32 %v1743_v19, 0.0 }
 0x428   : > { %v1976_v22 = vmax.f32 %v1974_v13, %v1975_v20  ;;  %v2014_v23 = vmax.f32 %v2013_v14, %v1871_v49 }
 0x429   : > { %v1997_v3 = vmax.f32 %v1995_v16, %v1996_v21  ;;  %v2035_v41 = vmax.f32 %v2034_v17, %v1872_v45 }
 0x42a   : > { %v1977_v25 = vrot.slane %v1976_v22, 1  ;;  %v2015_v27 = vrot.slane %v2014_v23, 4 }
 0x42b   : > { %v1998_v28 = vrot.slane %v1997_v3, 1  ;;  %v2036_v63 = vrot.slane %v2035_v41, 4 }
 0x42c   : > { %v1978_v2 = vmax.f32 %v1976_v22, %v1977_v25  ;;  %v2016_v4 = vmax.f32 %v2014_v23, %v2015_v27 }
 0x42d   : > { %v1999_v35 = vmax.f32 %v1997_v3, %v1998_v28  ;;  %v2037_v31 = vmax.f32 %v2035_v41, %v2036_v63 }
 0x42e   : > { %v2017_v32 = vrot.slane %v2016_v4, 2 }
 0x42f   : > { %v2052_v56 = vcombine.low %v1978_v2, %v1999_v35  ;;  %v2038_v33 = vrot.slane %v2037_v31, 2 }
 0x430   : > { %v2018_v37 = vmax.f32 %v2016_v4, %v2017_v32 }
 0x431   : > { %v2039_v43 = vmax.f32 %v2037_v31, %v2038_v33  ;;  %v2074_v52 = vrot.slane %v2052_v56, %v3533_v39 }
 0x432   : > { %v2019_v6 = vrot.slane %v2018_v37, 1 }
 0x433   : > { %v2040_v44 = vrot.slane %v2039_v43, 1 }
 0x434   : > { %v2020_v34 = vmax.f32 %v2018_v37, %v2019_v6 }
 0x435   : > { %v2041_v47 = vmax.f32 %v2039_v43, %v2040_v44 }
 0x437   : > { %v2053_v48 = vcombine.low %v2020_v34, %v2041_v47 }
 0x439   : > { %v2081_v55 = vrot.slane %v2053_v48, %v3533_v39 }
 0x43b   : > { %v2083_v57 = vcombine.low %v2074_v52, %v2081_v55 }
 0x43d   : > { %v2097_v59 = vrot.slane %v2083_v57, %v3533_v39 }
 0x43f   : > { %v2098_v62 = vcombine.low %v2090_v58, %v2097_v59 }
 0x441   : > { %v2100_v0 = vmax.f32 %v1873_v60, %v2098_v62 }
 0x443   : > { %2101 = vst [vmem:[%s2976_s30] sm:$0xff] %v2100_v0 }
 0x444   : > { %2687 = shalt.err (!%p2684_p11)
}
 0x445   : > { %s2688_s16 = scalar_lea.hbm %s3620_s27, 128  ;;  %s2692_s17 = scalar_lea.hbm %s3683_s7, 512 }
 0x446   : > { %p2689_p12 = scmp.ne.s32.totalorder %s3620_s27, %s2688_s16  ;;  %p2693_p0 = scmp.lt.u32.totalorder %s3620_s27, %s3683_s7 }
 0x447   : > { %p2694_p2 = scmp.lt.u32.totalorder %s2692_s17, %s2688_s16  ;;  %p2696_p10 = scmp.lt.u32.totalorder %s2688_s16, %s3620_s27 }
 0x448   : > { %p2690_p1 = pnand %p2689_p12, %p3702_p13 }
 0x449   : > { %p2695_p9 = por %p2694_p2, %p2693_p0 }
 0x44a   : > { %p2691_p3 = pneg %p2690_p1 }
 0x44b   : > { %p2697_p4 = por %p2696_p10, %p2695_p9 }
 0x44d   : > { %p2698_p5 = pnand %p2697_p4, %p2691_p3 }
 0x44f   : > { %2701 = shalt.err (!%p2698_p5)
}
 0x450   : > { %2484 = dma.vmem_to_hbm [thread:$0]  (%p3702_p13), %s3622_s23, 128, %s3620_s27, %s2103_s11  }
 0x451 PF: > { %p2501_p6 = scmp.ge.s32.totalorder %s2776_s8, 2  ;;  %s2129_s20 = sand.u32 1, %s2748_s24  }
 0x452   : > { %p3703_p7 = scmp.ne.s32.totalorder %s3696_s15, 0  ;;  %s2130_s21 = scalar_lea.sflag [#allocation4], %s2129_s20 }
 0x454   : > { %p2494_p8 = pnand %p2501_p6, %p3703_p7 }
 0x456   : > { %2743 = dma.done.wait (!%p2494_p8), %s2130_s21, 128  }
 0x457   : > { %2745 = vsyncadd (!%p2494_p8), %s2130_s21, 4294967168  ;;  %s22_s8 = sadd.s32 1, %s2776_s8   ;;  %s3704_s27 = sld [smem:[#allocation11_spill]] }
 0x458   : > { %p19_p11 = scmp.ge.s32.totalorder %s22_s8, 10   ;;  %s3705_s28 = sld [smem:[#allocation12_spill]] }
 0x459   : > { %s3706_s29 = sld [smem:[#allocation13_spill]]  ;;  %s3707_s30 = sld [smem:[#allocation14_spill]] }
 0x45a   : > { %s3708_s24 = smov %s2752_s25  ;;  %s3709_s25 = smov %s2756_s26 }
 0x45b   : > { %s3710_s26 = smov %s2906_s19  ;;  %21 = sbr.rel (!%p19_p11) target bundleno = 7 (0x7), region = 96 }
 0x462   :  { %2135 = vsyncpa [#allocation3], 1 }
 0x463   :  { %2137 = vsyncpa [#allocation3 + $0x1], 1 }
 0x464   :  { %2138 = vsyncpa [#allocation6], 1 }
 0x465   :  { %2139 = vsyncpa [#allocation4], 1 }
 0x466   :  { %2141 = vsyncpa [#allocation4 + $0x1], 1 }

</bundles_post_ra>
